<compile_context>
chip_gen: v5e
topology: v5e:2x2
jax: 0.10.0
libtpu: 0.0.40
codegen_flags: <defaults>
</compile_context>

<pallas_src>
import functools

import numpy as np
import jax
import jax.numpy as jnp
from jax.experimental import pallas as pl
from jax.experimental.pallas import tpu as pltpu


# ----------------------------- fused backbone kernel -------------------------------

def _backbone_kernel(
    patches_ref, patch_w_ref, tok_bias_ref,
    ln1_g_ref, ln1_b_ref, qkv_w_ref, qkv_b_ref, proj_w_ref, proj_b_ref, ls1_ref,
    ln2_g_ref, ln2_b_ref, fc1_w_ref, fc1_b_ref, fc2_w_ref, fc2_b_ref, ls2_ref,
    norm_g_ref, norm_b_ref,
    out_ref,
    tok_ref,
    *, heads, n_real, n_pool, eps):
    f32 = jnp.float32
    bf16 = jnp.bfloat16

    l = pl.program_id(1)
    depth = pl.num_programs(1)

    n_pad, D = tok_ref.shape
    dh = D // heads
    scale = 1.0 / (float(dh) ** 0.5)

    def layernorm(x, g, b):
        mu = jnp.mean(x, axis=-1, keepdims=True)
        xc = x - mu
        var = jnp.mean(xc * xc, axis=-1, keepdims=True)
        return xc * jax.lax.rsqrt(var + eps) * g + b

    # Additive key mask: padded token columns never contribute to the softmax.
    col = jax.lax.broadcasted_iota(jnp.int32, (1, n_pad), 1)
    key_mask = jnp.where(col < n_real, 0.0, -1e30).astype(f32)

    # ---- patch embed at the first layer; CLS + pos-embed + patch bias folded in ----
    @pl.when(l == 0)
    def _():
        tok_ref[...] = (jnp.dot(patches_ref[0], patch_w_ref[...],
                                preferred_element_type=f32)
                        + tok_bias_ref[...])

    tok = tok_ref[...]                                                # (n_pad, D) f32

    # ---- attention sub-block: tok += ls1 * proj(attn(LN1(tok))) ----
    h = layernorm(tok, ln1_g_ref[0], ln1_b_ref[0]).astype(bf16)
    qkv = jnp.dot(h, qkv_w_ref[0], preferred_element_type=f32) + qkv_b_ref[0]  # (n_pad, 3D)

    # TODO(synk): at DINOv2 scale, tile query tokens (flash-style) and batch the heads;
    #             the per-head loop is small (heads<=12) and depth is already on the grid.
    head_outs = []
    for hd in range(heads):
        q = qkv[:, hd * dh:(hd + 1) * dh]
        k = qkv[:, D + hd * dh:D + (hd + 1) * dh]
        v = qkv[:, 2 * D + hd * dh:2 * D + (hd + 1) * dh]
        s = jax.lax.dot_general(q.astype(bf16), k.astype(bf16),
                                (((1,), (1,)), ((), ())),
                                preferred_element_type=f32) * scale + key_mask
        s = s - jnp.max(s, axis=-1, keepdims=True)
        p = jnp.exp(s)
        p = p * pl.reciprocal(jnp.sum(p, axis=-1, keepdims=True), approx=True)
        head_outs.append(jnp.dot(p.astype(bf16), v.astype(bf16),
                                 preferred_element_type=f32))         # (n_pad, dh)

    attn = jnp.concatenate(head_outs, axis=-1).astype(bf16)           # (n_pad, D)
    attn = jnp.dot(attn, proj_w_ref[0], preferred_element_type=f32) + proj_b_ref[0]
    tok = tok + ls1_ref[0] * attn

    # ---- MLP sub-block: tok += ls2 * fc2(gelu(fc1(LN2(tok)))) ----
    h = layernorm(tok, ln2_g_ref[0], ln2_b_ref[0]).astype(bf16)
    h1 = jnp.dot(h, fc1_w_ref[0], preferred_element_type=f32) + fc1_b_ref[0]
    # TODO(synk): PyTorch nn.GELU default is exact erf; tanh approximation used here for
    #             guaranteed Mosaic lowering (EUP path).
    h1 = jax.nn.gelu(h1, approximate=True)
    h2 = jnp.dot(h1.astype(bf16), fc2_w_ref[0], preferred_element_type=f32) + fc2_b_ref[0]
    tok = tok + ls2_ref[0] * h2
    tok_ref[...] = tok

    # ---- last layer: final LayerNorm + fused "drop CLS + 2x2 avg pool" ----
    # The wrapper permuted tokens so the 4 members of each 2x2 window sit in 4 contiguous
    # n_pool-row blocks: pooling is 4 sublane slices summed on the VPU, scaled by 0.25.
    @pl.when(l == depth - 1)
    def _():
        ln = layernorm(tok, norm_g_ref[...], norm_b_ref[...])
        acc = (ln[1:1 + n_pool]
               + ln[1 + n_pool:1 + 2 * n_pool]
               + ln[1 + 2 * n_pool:1 + 3 * n_pool]
               + ln[1 + 3 * n_pool:1 + 4 * n_pool])
        out_ref[0] = 0.25 * acc


# ------------------------- parameters (deterministic) ------------------------

def init_params(key, *, in_chans=3, patch=4, img=16, embed_dim=32, depth=2,
                mlp_ratio=4):
    n_patches = (img // patch) ** 2
    num_tokens = n_patches + 1
    keys = iter(jax.random.split(key, 8 + 8 * depth))

    def nrm(shape, std=0.02):
        return (std * jax.random.normal(next(keys), shape)).astype(jnp.float32)

    hidden = mlp_ratio * embed_dim
    p = {
        "patch_w": nrm((in_chans * patch * patch, embed_dim)),
        "patch_b": jnp.zeros((embed_dim,), jnp.float32),
        "cls_token": nrm((1, 1, embed_dim)),
        "pos_embed": nrm((1, num_tokens, embed_dim)),
        "norm_g": jnp.ones((embed_dim,), jnp.float32),
        "norm_b": jnp.zeros((embed_dim,), jnp.float32),
        "blocks": [],
    }
    for _ in range(depth):
        p["blocks"].append({
            "ln1_g": jnp.ones((embed_dim,), jnp.float32),
            "ln1_b": jnp.zeros((embed_dim,), jnp.float32),
            "qkv_w": nrm((embed_dim, 3 * embed_dim)),
            "qkv_b": jnp.zeros((3 * embed_dim,), jnp.float32),
            "proj_w": nrm((embed_dim, embed_dim)),
            "proj_b": jnp.zeros((embed_dim,), jnp.float32),
            "ls1": 1e-5 * jnp.ones((embed_dim,), jnp.float32),   # DINOv2 LayerScale
            "ln2_g": jnp.ones((embed_dim,), jnp.float32),
            "ln2_b": jnp.zeros((embed_dim,), jnp.float32),
            "fc1_w": nrm((embed_dim, 4 * embed_dim)),
            "fc1_b": jnp.zeros((hidden,), jnp.float32),
            "fc2_w": nrm((hidden, embed_dim)),
            "fc2_b": jnp.zeros((embed_dim,), jnp.float32),
            "ls2": 1e-5 * jnp.ones((embed_dim,), jnp.float32),
        })
    return p


# ------------------------------ forward pass ---------------------------------

def dino_teacher_forward(params, x, *, patch=4, heads=2):
    """x: (B, 3, H, W) NCHW. Returns avg-pooled teacher features (B, D, H/patch/2, W/patch/2)."""
    B, C, H, W = x.shape
    Hp, Wp = H // patch, W // patch
    Ho, Wo = Hp // 2, Wp // 2
    Np = Hp * Wp
    Npool = Ho * Wo
    N = Np + 1
    Npad = ((N + 7) // 8) * 8            # pad token count to a sublane multiple
    D = params["patch_w"].shape[1]
    depth = len(params["blocks"])
    hidden = params["blocks"][0]["fc1_w"].shape[1]
    dh = D // heads
    Cpp = C * patch * patch

    # ---- patch unfold with a pooling-friendly token permutation ----
    # Token order: [CLS] + 4 blocks, one per 2x2-window offset (di, dj), each block holding
    # the Ho*Wo output positions in row-major order.  The transformer is permutation-
    # equivariant given the pos-embed is permuted identically, so this is exact.
    # TODO(synk): fold this unfold/permute into the kernel's DMA/index_map at DINOv2 scale.
    p = x.reshape(B, C, Ho, 2, patch, Wo, 2, patch)
    p = p.transpose(0, 3, 6, 2, 5, 1, 4, 7).reshape(B, Np, Cpp)
    patches = jnp.pad(p, ((0, 0), (1, Npad - N), (0, 0))).astype(jnp.bfloat16)

    # CLS token + pos-embed + patch bias folded into one additive (Npad, D) term,
    # with the pos-embed rows permuted to match the token order above.
    pos_cls = params["pos_embed"][0, :1]                               # (1, D)
    pos_patch = params["pos_embed"][0, 1:].reshape(Ho, 2, Wo, 2, D)
    pos_patch = pos_patch.transpose(1, 3, 0, 2, 4).reshape(Np, D)
    tok_bias = jnp.concatenate(
        [params["cls_token"].reshape(1, D) + pos_cls,
         params["patch_b"].reshape(1, D) + pos_patch], axis=0)         # (N, D)
    tok_bias = jnp.pad(tok_bias, ((0, Npad - N), (0, 0)))              # zero pad rows

    def stack(name):
        return jnp.stack([blk[name] for blk in params["blocks"]])

    patch_w = params["patch_w"].astype(jnp.bfloat16)                   # (Cpp, D)
    qkv_w = stack("qkv_w").astype(jnp.bfloat16)                        # (depth, D, 3D)
    qkv_b = stack("qkv_b").reshape(depth, 1, 3 * D)
    proj_w = stack("proj_w").astype(jnp.bfloat16)                      # (depth, D, D)
    proj_b = stack("proj_b").reshape(depth, 1, D)
    fc1_w = stack("fc1_w").astype(jnp.bfloat16)                        # (depth, D, hidden)
    fc1_b = stack("fc1_b").reshape(depth, 1, hidden)
    fc2_w = stack("fc2_w").astype(jnp.bfloat16)                        # (depth, hidden, D)
    fc2_b = stack("fc2_b").reshape(depth, 1, D)
    ln1_g = stack("ln1_g").reshape(depth, 1, D)
    ln1_b = stack("ln1_b").reshape(depth, 1, D)
    ln2_g = stack("ln2_g").reshape(depth, 1, D)
    ln2_b = stack("ln2_b").reshape(depth, 1, D)
    ls1 = stack("ls1").reshape(depth, 1, D)
    ls2 = stack("ls2").reshape(depth, 1, D)
    norm_g = params["norm_g"].reshape(1, D)
    norm_b = params["norm_b"].reshape(1, D)

    # Per-layer weights: block = one layer, streamed over the "arbitrary" depth axis.
    def layer_spec(arr):
        tail_zeros = (0,) * (arr.ndim - 1)
        def imap(b, l):
            return (l,) + tail_zeros
        return pl.BlockSpec((1,) + arr.shape[1:], imap)

    # Grid-invariant weights: constant block index -> DMA'd once and kept resident.
    def const_spec(arr):
        zeros = (0,) * arr.ndim
        def imap(b, l):
            return zeros
        return pl.BlockSpec(arr.shape, imap)

    kernel = functools.partial(_backbone_kernel, heads=heads,
                               n_real=N, n_pool=Npool, eps=1e-6)

    flops_layer = (2 * Npad * D * 3 * D              # fused QKV
                   + 4 * heads * Npad * Npad * dh    # scores + AV
                   + 2 * Npad * D * D                # output projection
                   + 4 * Npad * D * hidden)          # fc1 + fc2
    cost = pl.CostEstimate(
        flops=int(B * (2 * Npad * Cpp * D + depth * flops_layer)),
        transcendentals=int(B * depth * (heads * Npad * Npad + Npad * hidden)),
        bytes_accessed=int(x.size * x.dtype.itemsize
                           + B * Npool * D * 4
                           + sum(int(w.size) * w.dtype.itemsize
                                 for w in (qkv_w, proj_w, fc1_w, fc2_w, patch_w))),
    )

    pooled = pl.pallas_call(
        kernel,
        grid=(B, depth),
        in_specs=[
            pl.BlockSpec((1, Npad, Cpp), lambda b, l: (b, 0, 0)),
            const_spec(patch_w), const_spec(tok_bias),
            layer_spec(ln1_g), layer_spec(ln1_b),
            layer_spec(qkv_w), layer_spec(qkv_b),
            layer_spec(proj_w), layer_spec(proj_b), layer_spec(ls1),
            layer_spec(ln2_g), layer_spec(ln2_b),
            layer_spec(fc1_w), layer_spec(fc1_b),
            layer_spec(fc2_w), layer_spec(fc2_b), layer_spec(ls2),
            const_spec(norm_g), const_spec(norm_b),
        ],
        out_specs=pl.BlockSpec((1, Npool, D), lambda b, l: (b, 0, 0)),
        out_shape=jax.ShapeDtypeStruct((B, Npool, D), jnp.float32),
        scratch_shapes=[pltpu.VMEM((Npad, D), jnp.float32)],   # residual stream carry
        compiler_params=pltpu.CompilerParams(
            dimension_semantics=("parallel", "arbitrary"),
            vmem_limit_bytes=48 * 1024 * 1024),
        cost_estimate=cost,
    )(patches, patch_w, tok_bias,
      ln1_g, ln1_b, qkv_w, qkv_b, proj_w, proj_b, ls1,
      ln2_g, ln2_b, fc1_w, fc1_b, fc2_w, fc2_b, ls2,
      norm_g, norm_b)

    # (B, Ho*Wo, D) -> NCHW (B, D, Ho, Wo), matching F.avg_pool2d on the reshape=True feats.
    return pooled.reshape(B, Ho, Wo, D).transpose(0, 3, 1, 2)


# ---------------------------------- main --------------------------------------

if __name__ == "__main__":
    key = jax.random.PRNGKey(0)
    k_params, k_x = jax.random.split(key)

    params = init_params(k_params, in_chans=3, patch=4, img=16, embed_dim=32, depth=2)
    x = jax.random.normal(k_x, (2, 3, 16, 16), dtype=jnp.float32)   # NCHW, like PyTorch

    fwd = jax.jit(functools.partial(dino_teacher_forward, patch=4, heads=2))
    out = jax.block_until_ready(fwd(params, x))

    assert out.shape == (2, 32, 2, 2), out.shape
    assert bool(jnp.all(jnp.isfinite(out)))
    print("KERNEL_OK")
</pallas_src>

<mosaic_0001>
module attributes {stable_mosaic.version = 11 : i64} {
  func.func @_backbone_kernel(%arg0: i32, %arg1: i32, %arg2: memref<1x24x48xbf16, #tpu.memory_space<vmem>>, %arg3: memref<48x32xbf16, #tpu.memory_space<vmem>>, %arg4: memref<24x32xf32, #tpu.memory_space<vmem>>, %arg5: memref<1x1x32xf32, #tpu.memory_space<vmem>>, %arg6: memref<1x1x32xf32, #tpu.memory_space<vmem>>, %arg7: memref<1x32x96xbf16, #tpu.memory_space<vmem>>, %arg8: memref<1x1x96xf32, #tpu.memory_space<vmem>>, %arg9: memref<1x32x32xbf16, #tpu.memory_space<vmem>>, %arg10: memref<1x1x32xf32, #tpu.memory_space<vmem>>, %arg11: memref<1x1x32xf32, #tpu.memory_space<vmem>>, %arg12: memref<1x1x32xf32, #tpu.memory_space<vmem>>, %arg13: memref<1x1x32xf32, #tpu.memory_space<vmem>>, %arg14: memref<1x32x128xbf16, #tpu.memory_space<vmem>>, %arg15: memref<1x1x128xf32, #tpu.memory_space<vmem>>, %arg16: memref<1x128x32xbf16, #tpu.memory_space<vmem>>, %arg17: memref<1x1x32xf32, #tpu.memory_space<vmem>>, %arg18: memref<1x1x32xf32, #tpu.memory_space<vmem>>, %arg19: memref<1x32xf32, #tpu.memory_space<vmem>>, %arg20: memref<1x32xf32, #tpu.memory_space<vmem>>, %arg21: memref<1x4x32xf32, #tpu.memory_space<vmem>>, %arg22: memref<24x32xf32, #tpu.memory_space<vmem>>) attributes {dimension_semantics = [#tpu.dimension_semantics<parallel>, #tpu.dimension_semantics<arbitrary>], iteration_bounds = array<i64: 2, 2>, scalar_prefetch = 0 : i64, scratch_operands = 1 : i64, tpu.core_type = #tpu.core_type<tc>, window_params = [{transform_indices = @transform_0, window_bounds = array<i64: 1, 24, 48>}, {pipeline_mode = #tpu.pipeline_mode<synchronous>, transform_indices = @transform_1, window_bounds = array<i64: 48, 32>}, {pipeline_mode = #tpu.pipeline_mode<synchronous>, transform_indices = @transform_2, window_bounds = array<i64: 24, 32>}, {transform_indices = @transform_3, window_bounds = array<i64: 1, 1, 32>}, {transform_indices = @transform_4, window_bounds = array<i64: 1, 1, 32>}, {transform_indices = @transform_5, window_bounds = array<i64: 1, 32, 96>}, {transform_indices = @transform_6, window_bounds = array<i64: 1, 1, 96>}, {transform_indices = @transform_7, window_bounds = array<i64: 1, 32, 32>}, {transform_indices = @transform_8, window_bounds = array<i64: 1, 1, 32>}, {transform_indices = @transform_9, window_bounds = array<i64: 1, 1, 32>}, {transform_indices = @transform_10, window_bounds = array<i64: 1, 1, 32>}, {transform_indices = @transform_11, window_bounds = array<i64: 1, 1, 32>}, {transform_indices = @transform_12, window_bounds = array<i64: 1, 32, 128>}, {transform_indices = @transform_13, window_bounds = array<i64: 1, 1, 128>}, {transform_indices = @transform_14, window_bounds = array<i64: 1, 128, 32>}, {transform_indices = @transform_15, window_bounds = array<i64: 1, 1, 32>}, {transform_indices = @transform_16, window_bounds = array<i64: 1, 1, 32>}, {pipeline_mode = #tpu.pipeline_mode<synchronous>, transform_indices = @transform_17, window_bounds = array<i64: 1, 32>}, {pipeline_mode = #tpu.pipeline_mode<synchronous>, transform_indices = @transform_18, window_bounds = array<i64: 1, 32>}, {transform_indices = @transform_19, window_bounds = array<i64: 1, 4, 32>}]} {
    %0 = tpu.iota {dimensions = array<i32: 1>} : vector<1x24xi32>
    %c17_i32 = arith.constant 17 : i32
    %1 = vector.broadcast %c17_i32 : i32 to vector<1x24xi32>
    %2 = arith.cmpi slt, %0, %1 : vector<1x24xi32>
    %cst = arith.constant 0.000000e+00 : f32
    %cst_0 = arith.constant -1.000000e+30 : f32
    %3 = vector.broadcast %cst : f32 to vector<1x24xf32>
    %4 = vector.broadcast %cst_0 : f32 to vector<1x24xf32>
    %5 = arith.select %2, %3, %4 : vector<1x24xi1>, vector<1x24xf32>
    %c0_i32 = arith.constant 0 : i32
    %6 = arith.cmpi eq, %arg1, %c0_i32 : i32
    %7 = arith.extui %6 : i1 to i32
    %c0_i32_1 = arith.constant 0 : i32
    %8 = arith.cmpi ne, %7, %c0_i32_1 : i32
    scf.if %8 {
      %c0_76 = arith.constant 0 : index
      %c0_77 = arith.constant 0 : index
      %c0_78 = arith.constant 0 : index
      %164 = vector.load %arg2[%c0_76, %c0_77, %c0_78] : memref<1x24x48xbf16, #tpu.memory_space<vmem>>, vector<1x24x48xbf16>
      %165 = vector.shape_cast %164 : vector<1x24x48xbf16> to vector<24x48xbf16>
      %c0_79 = arith.constant 0 : index
      %c0_80 = arith.constant 0 : index
      %166 = vector.load %arg3[%c0_79, %c0_80] : memref<48x32xbf16, #tpu.memory_space<vmem>>, vector<48x32xbf16>
      %cst_81 = arith.constant dense<0.000000e+00> : vector<24x32xf32>
      %167 = tpu.matmul %165, %166, %cst_81 {dimension_numbers = #tpu.dot_dimension_numbers<[1], [0], [0], [1], [0, 0, 1, 1], [], []>} : vector<24x48xbf16>, vector<48x32xbf16>, vector<24x32xf32> -> vector<24x32xf32>
      %c0_82 = arith.constant 0 : index
      %c0_83 = arith.constant 0 : index
      %168 = vector.load %arg4[%c0_82, %c0_83] : memref<24x32xf32, #tpu.memory_space<vmem>>, vector<24x32xf32>
      %169 = arith.addf %167, %168 : vector<24x32xf32>
      %c0_84 = arith.constant 0 : index
      %c0_85 = arith.constant 0 : index
      %170 = vector.load %arg22[%c0_84, %c0_85] : memref<24x32xf32, #tpu.memory_space<vmem>>, vector<24x32xf32>
      tpu.vector_store %arg22[%c0_84, %c0_85], %169 {strides = array<i32>} : memref<24x32xf32, #tpu.memory_space<vmem>>, vector<24x32xf32>,
    } else {
    }
    %c0 = arith.constant 0 : index
    %c0_2 = arith.constant 0 : index
    %9 = vector.load %arg22[%c0, %c0_2] : memref<24x32xf32, #tpu.memory_space<vmem>>, vector<24x32xf32>
    %c0_3 = arith.constant 0 : index
    %c0_4 = arith.constant 0 : index
    %c0_5 = arith.constant 0 : index
    %10 = vector.load %arg5[%c0_3, %c0_4, %c0_5] : memref<1x1x32xf32, #tpu.memory_space<vmem>>, vector<1x1x32xf32>
    %11 = vector.shape_cast %10 : vector<1x1x32xf32> to vector<1x32xf32>
    %c0_6 = arith.constant 0 : index
    %c0_7 = arith.constant 0 : index
    %c0_8 = arith.constant 0 : index
    %12 = vector.load %arg6[%c0_6, %c0_7, %c0_8] : memref<1x1x32xf32, #tpu.memory_space<vmem>>, vector<1x1x32xf32>
    %13 = vector.shape_cast %12 : vector<1x1x32xf32> to vector<1x32xf32>
    %cst_9 = arith.constant dense<0.000000e+00> : vector<24xf32>
    %14 = vector.multi_reduction <add>, %9, %cst_9 [1] : vector<24x32xf32> to vector<24xf32>
    %15 = vector.shape_cast %14 : vector<24xf32> to vector<24x1xf32>
    %cst_10 = arith.constant 3.200000e+01 : f32
    %16 = vector.broadcast %cst_10 : f32 to vector<24x1xf32>
    %17 = arith.divf %15, %16 : vector<24x1xf32>
    %18 = vector.broadcast %17 : vector<24x1xf32> to vector<24x32xf32>
    %19 = arith.subf %9, %18 : vector<24x32xf32>
    %20 = arith.mulf %19, %19 : vector<24x32xf32>
    %cst_11 = arith.constant dense<0.000000e+00> : vector<24xf32>
    %21 = vector.multi_reduction <add>, %20, %cst_11 [1] : vector<24x32xf32> to vector<24xf32>
    %22 = vector.shape_cast %21 : vector<24xf32> to vector<24x1xf32>
    %cst_12 = arith.constant 3.200000e+01 : f32
    %23 = vector.broadcast %cst_12 : f32 to vector<24x1xf32>
    %24 = arith.divf %22, %23 : vector<24x1xf32>
    %cst_13 = arith.constant 9.99999997E-7 : f32
    %25 = vector.broadcast %cst_13 : f32 to vector<24x1xf32>
    %26 = arith.addf %24, %25 : vector<24x1xf32>
    %27 = math.rsqrt %26 : vector<24x1xf32>
    %28 = vector.broadcast %27 : vector<24x1xf32> to vector<24x32xf32>
    %29 = arith.mulf %19, %28 : vector<24x32xf32>
    %30 = vector.broadcast %11 : vector<1x32xf32> to vector<24x32xf32>
    %31 = arith.mulf %29, %30 : vector<24x32xf32>
    %32 = vector.broadcast %13 : vector<1x32xf32> to vector<24x32xf32>
    %33 = arith.addf %31, %32 : vector<24x32xf32>
    %34 = arith.truncf %33 : vector<24x32xf32> to vector<24x32xbf16>
    %c0_14 = arith.constant 0 : index
    %c0_15 = arith.constant 0 : index
    %c0_16 = arith.constant 0 : index
    %35 = vector.load %arg7[%c0_14, %c0_15, %c0_16] : memref<1x32x96xbf16, #tpu.memory_space<vmem>>, vector<1x32x96xbf16>
    %36 = vector.shape_cast %35 : vector<1x32x96xbf16> to vector<32x96xbf16>
    %cst_17 = arith.constant dense<0.000000e+00> : vector<24x96xf32>
    %37 = tpu.matmul %34, %36, %cst_17 {dimension_numbers = #tpu.dot_dimension_numbers<[1], [0], [0], [1], [0, 0, 1, 1], [], []>} : vector<24x32xbf16>, vector<32x96xbf16>, vector<24x96xf32> -> vector<24x96xf32>
    %c0_18 = arith.constant 0 : index
    %c0_19 = arith.constant 0 : index
    %c0_20 = arith.constant 0 : index
    %38 = vector.load %arg8[%c0_18, %c0_19, %c0_20] : memref<1x1x96xf32, #tpu.memory_space<vmem>>, vector<1x1x96xf32>
    %39 = vector.shape_cast %38 : vector<1x1x96xf32> to vector<1x96xf32>
    %40 = vector.broadcast %39 : vector<1x96xf32> to vector<24x96xf32>
    %41 = arith.addf %37, %40 : vector<24x96xf32>
    %42 = vector.extract_strided_slice %41 {offsets = [0, 0], sizes = [24, 16], strides = [1, 1]} : vector<24x96xf32> to vector<24x16xf32>
    %43 = vector.extract_strided_slice %41 {offsets = [0, 32], sizes = [24, 16], strides = [1, 1]} : vector<24x96xf32> to vector<24x16xf32>
    %44 = vector.extract_strided_slice %41 {offsets = [0, 64], sizes = [24, 16], strides = [1, 1]} : vector<24x96xf32> to vector<24x16xf32>
    %45 = arith.truncf %42 : vector<24x16xf32> to vector<24x16xbf16>
    %46 = arith.truncf %43 : vector<24x16xf32> to vector<24x16xbf16>
    %cst_21 = arith.constant dense<0.000000e+00> : vector<24x24xf32>
    %47 = tpu.matmul %45, %46, %cst_21 {dimension_numbers = #tpu.dot_dimension_numbers<[1], [1], [0], [0], [0, 0, 1, 0], [], []>} : vector<24x16xbf16>, vector<24x16xbf16>, vector<24x24xf32> -> vector<24x24xf32>
    %cst_22 = arith.constant 2.500000e-01 : f32
    %48 = vector.broadcast %cst_22 : f32 to vector<24x24xf32>
    %49 = arith.mulf %47, %48 : vector<24x24xf32>
    %50 = vector.broadcast %5 : vector<1x24xf32> to vector<24x24xf32>
    %51 = arith.addf %49, %50 : vector<24x24xf32>
    %cst_23 = arith.constant dense<0xFF800000> : vector<24xf32>
    %52 = vector.multi_reduction <maximumf>, %51, %cst_23 [1] : vector<24x24xf32> to vector<24xf32>
    %53 = vector.shape_cast %52 : vector<24xf32> to vector<24x1xf32>
    %54 = vector.broadcast %53 : vector<24x1xf32> to vector<24x24xf32>
    %55 = arith.subf %51, %54 : vector<24x24xf32>
    %56 = math.exp %55 : vector<24x24xf32>
    %cst_24 = arith.constant dense<0.000000e+00> : vector<24xf32>
    %57 = vector.multi_reduction <add>, %56, %cst_24 [1] : vector<24x24xf32> to vector<24xf32>
    %58 = vector.shape_cast %57 : vector<24xf32> to vector<24x1xf32>
    %59 = tpu.reciprocal %58 {approx = true} : vector<24x1xf32> -> vector<24x1xf32>
    %60 = vector.broadcast %59 : vector<24x1xf32> to vector<24x24xf32>
    %61 = arith.mulf %56, %60 : vector<24x24xf32>
    %62 = arith.truncf %61 : vector<24x24xf32> to vector<24x24xbf16>
    %63 = arith.truncf %44 : vector<24x16xf32> to vector<24x16xbf16>
    %cst_25 = arith.constant dense<0.000000e+00> : vector<24x16xf32>
    %64 = tpu.matmul %62, %63, %cst_25 {dimension_numbers = #tpu.dot_dimension_numbers<[1], [0], [0], [1], [0, 0, 1, 1], [], []>} : vector<24x24xbf16>, vector<24x16xbf16>, vector<24x16xf32> -> vector<24x16xf32>
    %65 = vector.extract_strided_slice %41 {offsets = [0, 16], sizes = [24, 16], strides = [1, 1]} : vector<24x96xf32> to vector<24x16xf32>
    %66 = vector.extract_strided_slice %41 {offsets = [0, 48], sizes = [24, 16], strides = [1, 1]} : vector<24x96xf32> to vector<24x16xf32>
    %67 = vector.extract_strided_slice %41 {offsets = [0, 80], sizes = [24, 16], strides = [1, 1]} : vector<24x96xf32> to vector<24x16xf32>
    %68 = arith.truncf %65 : vector<24x16xf32> to vector<24x16xbf16>
    %69 = arith.truncf %66 : vector<24x16xf32> to vector<24x16xbf16>
    %cst_26 = arith.constant dense<0.000000e+00> : vector<24x24xf32>
    %70 = tpu.matmul %68, %69, %cst_26 {dimension_numbers = #tpu.dot_dimension_numbers<[1], [1], [0], [0], [0, 0, 1, 0], [], []>} : vector<24x16xbf16>, vector<24x16xbf16>, vector<24x24xf32> -> vector<24x24xf32>
    %cst_27 = arith.constant 2.500000e-01 : f32
    %71 = vector.broadcast %cst_27 : f32 to vector<24x24xf32>
    %72 = arith.mulf %70, %71 : vector<24x24xf32>
    %73 = vector.broadcast %5 : vector<1x24xf32> to vector<24x24xf32>
    %74 = arith.addf %72, %73 : vector<24x24xf32>
    %cst_28 = arith.constant dense<0xFF800000> : vector<24xf32>
    %75 = vector.multi_reduction <maximumf>, %74, %cst_28 [1] : vector<24x24xf32> to vector<24xf32>
    %76 = vector.shape_cast %75 : vector<24xf32> to vector<24x1xf32>
    %77 = vector.broadcast %76 : vector<24x1xf32> to vector<24x24xf32>
    %78 = arith.subf %74, %77 : vector<24x24xf32>
    %79 = math.exp %78 : vector<24x24xf32>
    %cst_29 = arith.constant dense<0.000000e+00> : vector<24xf32>
    %80 = vector.multi_reduction <add>, %79, %cst_29 [1] : vector<24x24xf32> to vector<24xf32>
    %81 = vector.shape_cast %80 : vector<24xf32> to vector<24x1xf32>
    %82 = tpu.reciprocal %81 {approx = true} : vector<24x1xf32> -> vector<24x1xf32>
    %83 = vector.broadcast %82 : vector<24x1xf32> to vector<24x24xf32>
    %84 = arith.mulf %79, %83 : vector<24x24xf32>
    %85 = arith.truncf %84 : vector<24x24xf32> to vector<24x24xbf16>
    %86 = arith.truncf %67 : vector<24x16xf32> to vector<24x16xbf16>
    %cst_30 = arith.constant dense<0.000000e+00> : vector<24x16xf32>
    %87 = tpu.matmul %85, %86, %cst_30 {dimension_numbers = #tpu.dot_dimension_numbers<[1], [0], [0], [1], [0, 0, 1, 1], [], []>} : vector<24x24xbf16>, vector<24x16xbf16>, vector<24x16xf32> -> vector<24x16xf32>
    %88 = tpu.concatenate %64, %87 in 1 : vector<24x16xf32>, vector<24x16xf32> -> vector<24x32xf32>
    %89 = arith.truncf %88 : vector<24x32xf32> to vector<24x32xbf16>
    %c0_31 = arith.constant 0 : index
    %c0_32 = arith.constant 0 : index
    %c0_33 = arith.constant 0 : index
    %90 = vector.load %arg9[%c0_31, %c0_32, %c0_33] : memref<1x32x32xbf16, #tpu.memory_space<vmem>>, vector<1x32x32xbf16>
    %91 = vector.shape_cast %90 : vector<1x32x32xbf16> to vector<32x32xbf16>
    %cst_34 = arith.constant dense<0.000000e+00> : vector<24x32xf32>
    %92 = tpu.matmul %89, %91, %cst_34 {dimension_numbers = #tpu.dot_dimension_numbers<[1], [0], [0], [1], [0, 0, 1, 1], [], []>} : vector<24x32xbf16>, vector<32x32xbf16>, vector<24x32xf32> -> vector<24x32xf32>
    %c0_35 = arith.constant 0 : index
    %c0_36 = arith.constant 0 : index
    %c0_37 = arith.constant 0 : index
    %93 = vector.load %arg10[%c0_35, %c0_36, %c0_37] : memref<1x1x32xf32, #tpu.memory_space<vmem>>, vector<1x1x32xf32>
    %94 = vector.shape_cast %93 : vector<1x1x32xf32> to vector<1x32xf32>
    %95 = vector.broadcast %94 : vector<1x32xf32> to vector<24x32xf32>
    %96 = arith.addf %92, %95 : vector<24x32xf32>
    %c0_38 = arith.constant 0 : index
    %c0_39 = arith.constant 0 : index
    %c0_40 = arith.constant 0 : index
    %97 = vector.load %arg11[%c0_38, %c0_39, %c0_40] : memref<1x1x32xf32, #tpu.memory_space<vmem>>, vector<1x1x32xf32>
    %98 = vector.shape_cast %97 : vector<1x1x32xf32> to vector<1x32xf32>
    %99 = vector.broadcast %98 : vector<1x32xf32> to vector<24x32xf32>
    %100 = arith.mulf %99, %96 : vector<24x32xf32>
    %101 = arith.addf %9, %100 : vector<24x32xf32>
    %c0_41 = arith.constant 0 : index
    %c0_42 = arith.constant 0 : index
    %c0_43 = arith.constant 0 : index
    %102 = vector.load %arg12[%c0_41, %c0_42, %c0_43] : memref<1x1x32xf32, #tpu.memory_space<vmem>>, vector<1x1x32xf32>
    %103 = vector.shape_cast %102 : vector<1x1x32xf32> to vector<1x32xf32>
    %c0_44 = arith.constant 0 : index
    %c0_45 = arith.constant 0 : index
    %c0_46 = arith.constant 0 : index
    %104 = vector.load %arg13[%c0_44, %c0_45, %c0_46] : memref<1x1x32xf32, #tpu.memory_space<vmem>>, vector<1x1x32xf32>
    %105 = vector.shape_cast %104 : vector<1x1x32xf32> to vector<1x32xf32>
    %cst_47 = arith.constant dense<0.000000e+00> : vector<24xf32>
    %106 = vector.multi_reduction <add>, %101, %cst_47 [1] : vector<24x32xf32> to vector<24xf32>
    %107 = vector.shape_cast %106 : vector<24xf32> to vector<24x1xf32>
    %cst_48 = arith.constant 3.200000e+01 : f32
    %108 = vector.broadcast %cst_48 : f32 to vector<24x1xf32>
    %109 = arith.divf %107, %108 : vector<24x1xf32>
    %110 = vector.broadcast %109 : vector<24x1xf32> to vector<24x32xf32>
    %111 = arith.subf %101, %110 : vector<24x32xf32>
    %112 = arith.mulf %111, %111 : vector<24x32xf32>
    %cst_49 = arith.constant dense<0.000000e+00> : vector<24xf32>
    %113 = vector.multi_reduction <add>, %112, %cst_49 [1] : vector<24x32xf32> to vector<24xf32>
    %114 = vector.shape_cast %113 : vector<24xf32> to vector<24x1xf32>
    %cst_50 = arith.constant 3.200000e+01 : f32
    %115 = vector.broadcast %cst_50 : f32 to vector<24x1xf32>
    %116 = arith.divf %114, %115 : vector<24x1xf32>
    %cst_51 = arith.constant 9.99999997E-7 : f32
    %117 = vector.broadcast %cst_51 : f32 to vector<24x1xf32>
    %118 = arith.addf %116, %117 : vector<24x1xf32>
    %119 = math.rsqrt %118 : vector<24x1xf32>
    %120 = vector.broadcast %119 : vector<24x1xf32> to vector<24x32xf32>
    %121 = arith.mulf %111, %120 : vector<24x32xf32>
    %122 = vector.broadcast %103 : vector<1x32xf32> to vector<24x32xf32>
    %123 = arith.mulf %121, %122 : vector<24x32xf32>
    %124 = vector.broadcast %105 : vector<1x32xf32> to vector<24x32xf32>
    %125 = arith.addf %123, %124 : vector<24x32xf32>
    %126 = arith.truncf %125 : vector<24x32xf32> to vector<24x32xbf16>
    %c0_52 = arith.constant 0 : index
    %c0_53 = arith.constant 0 : index
    %c0_54 = arith.constant 0 : index
    %127 = vector.load %arg14[%c0_52, %c0_53, %c0_54] : memref<1x32x128xbf16, #tpu.memory_space<vmem>>, vector<1x32x128xbf16>
    %128 = vector.shape_cast %127 : vector<1x32x128xbf16> to vector<32x128xbf16>
    %cst_55 = arith.constant dense<0.000000e+00> : vector<24x128xf32>
    %129 = tpu.matmul %126, %128, %cst_55 {dimension_numbers = #tpu.dot_dimension_numbers<[1], [0], [0], [1], [0, 0, 1, 1], [], []>} : vector<24x32xbf16>, vector<32x128xbf16>, vector<24x128xf32> -> vector<24x128xf32>
    %c0_56 = arith.constant 0 : index
    %c0_57 = arith.constant 0 : index
    %c0_58 = arith.constant 0 : index
    %130 = vector.load %arg15[%c0_56, %c0_57, %c0_58] : memref<1x1x128xf32, #tpu.memory_space<vmem>>, vector<1x1x128xf32>
    %131 = vector.shape_cast %130 : vector<1x1x128xf32> to vector<1x128xf32>
    %132 = vector.broadcast %131 : vector<1x128xf32> to vector<24x128xf32>
    %133 = arith.addf %129, %132 : vector<24x128xf32>
    %134 = arith.mulf %133, %133 : vector<24x128xf32>
    %135 = arith.mulf %133, %134 : vector<24x128xf32>
    %cst_59 = arith.constant 4.471500e-02 : f32
    %136 = vector.broadcast %cst_59 : f32 to vector<24x128xf32>
    %137 = arith.mulf %136, %135 : vector<24x128xf32>
    %138 = arith.addf %133, %137 : vector<24x128xf32>
    %cst_60 = arith.constant 0.797884583 : f32
    %139 = vector.broadcast %cst_60 : f32 to vector<24x128xf32>
    %140 = arith.mulf %139, %138 : vector<24x128xf32>
    %141 = math.tanh %140 : vector<24x128xf32>
    %cst_61 = arith.constant 1.000000e+00 : f32
    %142 = vector.broadcast %cst_61 : f32 to vector<24x128xf32>
    %143 = arith.addf %142, %141 : vector<24x128xf32>
    %cst_62 = arith.constant 5.000000e-01 : f32
    %144 = vector.broadcast %cst_62 : f32 to vector<24x128xf32>
    %145 = arith.mulf %144, %143 : vector<24x128xf32>
    %146 = arith.mulf %133, %145 : vector<24x128xf32>
    %147 = arith.truncf %146 : vector<24x128xf32> to vector<24x128xbf16>
    %c0_63 = arith.constant 0 : index
    %c0_64 = arith.constant 0 : index
    %c0_65 = arith.constant 0 : index
    %148 = vector.load %arg16[%c0_63, %c0_64, %c0_65] : memref<1x128x32xbf16, #tpu.memory_space<vmem>>, vector<1x128x32xbf16>
    %149 = vector.shape_cast %148 : vector<1x128x32xbf16> to vector<128x32xbf16>
    %cst_66 = arith.constant dense<0.000000e+00> : vector<24x32xf32>
    %150 = tpu.matmul %147, %149, %cst_66 {dimension_numbers = #tpu.dot_dimension_numbers<[1], [0], [0], [1], [0, 0, 1, 1], [], []>} : vector<24x128xbf16>, vector<128x32xbf16>, vector<24x32xf32> -> vector<24x32xf32>
    %c0_67 = arith.constant 0 : index
    %c0_68 = arith.constant 0 : index
    %c0_69 = arith.constant 0 : index
    %151 = vector.load %arg17[%c0_67, %c0_68, %c0_69] : memref<1x1x32xf32, #tpu.memory_space<vmem>>, vector<1x1x32xf32>
    %152 = vector.shape_cast %151 : vector<1x1x32xf32> to vector<1x32xf32>
    %153 = vector.broadcast %152 : vector<1x32xf32> to vector<24x32xf32>
    %154 = arith.addf %150, %153 : vector<24x32xf32>
    %c0_70 = arith.constant 0 : index
    %c0_71 = arith.constant 0 : index
    %c0_72 = arith.constant 0 : index
    %155 = vector.load %arg18[%c0_70, %c0_71, %c0_72] : memref<1x1x32xf32, #tpu.memory_space<vmem>>, vector<1x1x32xf32>
    %156 = vector.shape_cast %155 : vector<1x1x32xf32> to vector<1x32xf32>
    %157 = vector.broadcast %156 : vector<1x32xf32> to vector<24x32xf32>
    %158 = arith.mulf %157, %154 : vector<24x32xf32>
    %159 = arith.addf %101, %158 : vector<24x32xf32>
    %c0_73 = arith.constant 0 : index
    %c0_74 = arith.constant 0 : index
    %160 = vector.load %arg22[%c0_73, %c0_74] : memref<24x32xf32, #tpu.memory_space<vmem>>, vector<24x32xf32>
    tpu.vector_store %arg22[%c0_73, %c0_74], %159 {strides = array<i32>} : memref<24x32xf32, #tpu.memory_space<vmem>>, vector<24x32xf32>,
    %c1_i32 = arith.constant 1 : i32
    %161 = arith.cmpi eq, %arg1, %c1_i32 : i32
    %162 = arith.extui %161 : i1 to i32
    %c0_i32_75 = arith.constant 0 : i32
    %163 = arith.cmpi ne, %162, %c0_i32_75 : i32
    scf.if %163 {
      %c0_76 = arith.constant 0 : index
      %c0_77 = arith.constant 0 : index
      %164 = vector.load %arg19[%c0_76, %c0_77] : memref<1x32xf32, #tpu.memory_space<vmem>>, vector<1x32xf32>
      %c0_78 = arith.constant 0 : index
      %c0_79 = arith.constant 0 : index
      %165 = vector.load %arg20[%c0_78, %c0_79] : memref<1x32xf32, #tpu.memory_space<vmem>>, vector<1x32xf32>
      %cst_80 = arith.constant dense<0.000000e+00> : vector<24xf32>
      %166 = vector.multi_reduction <add>, %159, %cst_80 [1] : vector<24x32xf32> to vector<24xf32>
      %167 = vector.shape_cast %166 : vector<24xf32> to vector<24x1xf32>
      %cst_81 = arith.constant 3.200000e+01 : f32
      %168 = vector.broadcast %cst_81 : f32 to vector<24x1xf32>
      %169 = arith.divf %167, %168 : vector<24x1xf32>
      %170 = vector.broadcast %169 : vector<24x1xf32> to vector<24x32xf32>
      %171 = arith.subf %159, %170 : vector<24x32xf32>
      %172 = arith.mulf %171, %171 : vector<24x32xf32>
      %cst_82 = arith.constant dense<0.000000e+00> : vector<24xf32>
      %173 = vector.multi_reduction <add>, %172, %cst_82 [1] : vector<24x32xf32> to vector<24xf32>
      %174 = vector.shape_cast %173 : vector<24xf32> to vector<24x1xf32>
      %cst_83 = arith.constant 3.200000e+01 : f32
      %175 = vector.broadcast %cst_83 : f32 to vector<24x1xf32>
      %176 = arith.divf %174, %175 : vector<24x1xf32>
      %cst_84 = arith.constant 9.99999997E-7 : f32
      %177 = vector.broadcast %cst_84 : f32 to vector<24x1xf32>
      %178 = arith.addf %176, %177 : vector<24x1xf32>
      %179 = math.rsqrt %178 : vector<24x1xf32>
      %180 = vector.broadcast %179 : vector<24x1xf32> to vector<24x32xf32>
      %181 = arith.mulf %171, %180 : vector<24x32xf32>
      %182 = vector.broadcast %164 : vector<1x32xf32> to vector<24x32xf32>
      %183 = arith.mulf %181, %182 : vector<24x32xf32>
      %184 = vector.broadcast %165 : vector<1x32xf32> to vector<24x32xf32>
      %185 = arith.addf %183, %184 : vector<24x32xf32>
      %186 = vector.extract_strided_slice %185 {offsets = [1, 0], sizes = [4, 32], strides = [1, 1]} : vector<24x32xf32> to vector<4x32xf32>
      %187 = vector.extract_strided_slice %185 {offsets = [5, 0], sizes = [4, 32], strides = [1, 1]} : vector<24x32xf32> to vector<4x32xf32>
      %188 = arith.addf %186, %187 : vector<4x32xf32>
      %189 = vector.extract_strided_slice %185 {offsets = [9, 0], sizes = [4, 32], strides = [1, 1]} : vector<24x32xf32> to vector<4x32xf32>
      %190 = arith.addf %188, %189 : vector<4x32xf32>
      %191 = vector.extract_strided_slice %185 {offsets = [13, 0], sizes = [4, 32], strides = [1, 1]} : vector<24x32xf32> to vector<4x32xf32>
      %192 = arith.addf %190, %191 : vector<4x32xf32>
      %cst_85 = arith.constant 2.500000e-01 : f32
      %193 = vector.broadcast %cst_85 : f32 to vector<4x32xf32>
      %194 = arith.mulf %193, %192 : vector<4x32xf32>
      %c0_86 = arith.constant 0 : index
      %c0_87 = arith.constant 0 : index
      %c0_88 = arith.constant 0 : index
      %195 = vector.load %arg21[%c0_86, %c0_87, %c0_88] : memref<1x4x32xf32, #tpu.memory_space<vmem>>, vector<1x4x32xf32>
      %196 = vector.shape_cast %195 : vector<1x4x32xf32> to vector<4x32xf32>
      %197 = vector.shape_cast %194 : vector<4x32xf32> to vector<1x4x32xf32>
      tpu.vector_store %arg21[%c0_86, %c0_87, %c0_88], %197 {strides = array<i32>} : memref<1x4x32xf32, #tpu.memory_space<vmem>>, vector<1x4x32xf32>,
    } else {
    }
    return
  }
  func.func @transform_0(%arg0: i32, %arg1: i32) -> (i32, i32, i32) {
    %c0_i32 = arith.constant 0 : i32
    %c0_i32_0 = arith.constant 0 : i32
    %c0_i32_1 = arith.constant 0 : i32
    return %arg0, %c0_i32, %c0_i32_0 : i32, i32, i32
  }
  func.func @transform_1(%arg0: i32, %arg1: i32) -> (i32, i32) {
    %c0_i32 = arith.constant 0 : i32
    %c0_i32_0 = arith.constant 0 : i32
    %c0_i32_1 = arith.constant 0 : i32
    return %c0_i32, %c0_i32_0 : i32, i32
  }
  func.func @transform_2(%arg0: i32, %arg1: i32) -> (i32, i32) {
    %c0_i32 = arith.constant 0 : i32
    %c0_i32_0 = arith.constant 0 : i32
    %c0_i32_1 = arith.constant 0 : i32
    return %c0_i32, %c0_i32_0 : i32, i32
  }
  func.func @transform_3(%arg0: i32, %arg1: i32) -> (i32, i32, i32) {
    %c0_i32 = arith.constant 0 : i32
    %c0_i32_0 = arith.constant 0 : i32
    %c0_i32_1 = arith.constant 0 : i32
    return %arg1, %c0_i32, %c0_i32_0 : i32, i32, i32
  }
  func.func @transform_4(%arg0: i32, %arg1: i32) -> (i32, i32, i32) {
    %c0_i32 = arith.constant 0 : i32
    %c0_i32_0 = arith.constant 0 : i32
    %c0_i32_1 = arith.constant 0 : i32
    return %arg1, %c0_i32, %c0_i32_0 : i32, i32, i32
  }
  func.func @transform_5(%arg0: i32, %arg1: i32) -> (i32, i32, i32) {
    %c0_i32 = arith.constant 0 : i32
    %c0_i32_0 = arith.constant 0 : i32
    %c0_i32_1 = arith.constant 0 : i32
    return %arg1, %c0_i32, %c0_i32_0 : i32, i32, i32
  }
  func.func @transform_6(%arg0: i32, %arg1: i32) -> (i32, i32, i32) {
    %c0_i32 = arith.constant 0 : i32
    %c0_i32_0 = arith.constant 0 : i32
    %c0_i32_1 = arith.constant 0 : i32
    return %arg1, %c0_i32, %c0_i32_0 : i32, i32, i32
  }
  func.func @transform_7(%arg0: i32, %arg1: i32) -> (i32, i32, i32) {
    %c0_i32 = arith.constant 0 : i32
    %c0_i32_0 = arith.constant 0 : i32
    %c0_i32_1 = arith.constant 0 : i32
    return %arg1, %c0_i32, %c0_i32_0 : i32, i32, i32
  }
  func.func @transform_8(%arg0: i32, %arg1: i32) -> (i32, i32, i32) {
    %c0_i32 = arith.constant 0 : i32
    %c0_i32_0 = arith.constant 0 : i32
    %c0_i32_1 = arith.constant 0 : i32
    return %arg1, %c0_i32, %c0_i32_0 : i32, i32, i32
  }
  func.func @transform_9(%arg0: i32, %arg1: i32) -> (i32, i32, i32) {
    %c0_i32 = arith.constant 0 : i32
    %c0_i32_0 = arith.constant 0 : i32
    %c0_i32_1 = arith.constant 0 : i32
    return %arg1, %c0_i32, %c0_i32_0 : i32, i32, i32
  }
  func.func @transform_10(%arg0: i32, %arg1: i32) -> (i32, i32, i32) {
    %c0_i32 = arith.constant 0 : i32
    %c0_i32_0 = arith.constant 0 : i32
    %c0_i32_1 = arith.constant 0 : i32
    return %arg1, %c0_i32, %c0_i32_0 : i32, i32, i32
  }
  func.func @transform_11(%arg0: i32, %arg1: i32) -> (i32, i32, i32) {
    %c0_i32 = arith.constant 0 : i32
    %c0_i32_0 = arith.constant 0 : i32
    %c0_i32_1 = arith.constant 0 : i32
    return %arg1, %c0_i32, %c0_i32_0 : i32, i32, i32
  }
  func.func @transform_12(%arg0: i32, %arg1: i32) -> (i32, i32, i32) {
    %c0_i32 = arith.constant 0 : i32
    %c0_i32_0 = arith.constant 0 : i32
    %c0_i32_1 = arith.constant 0 : i32
    return %arg1, %c0_i32, %c0_i32_0 : i32, i32, i32
  }
  func.func @transform_13(%arg0: i32, %arg1: i32) -> (i32, i32, i32) {
    %c0_i32 = arith.constant 0 : i32
    %c0_i32_0 = arith.constant 0 : i32
    %c0_i32_1 = arith.constant 0 : i32
    return %arg1, %c0_i32, %c0_i32_0 : i32, i32, i32
  }
  func.func @transform_14(%arg0: i32, %arg1: i32) -> (i32, i32, i32) {
    %c0_i32 = arith.constant 0 : i32
    %c0_i32_0 = arith.constant 0 : i32
    %c0_i32_1 = arith.constant 0 : i32
    return %arg1, %c0_i32, %c0_i32_0 : i32, i32, i32
  }
  func.func @transform_15(%arg0: i32, %arg1: i32) -> (i32, i32, i32) {
    %c0_i32 = arith.constant 0 : i32
    %c0_i32_0 = arith.constant 0 : i32
    %c0_i32_1 = arith.constant 0 : i32
    return %arg1, %c0_i32, %c0_i32_0 : i32, i32, i32
  }
  func.func @transform_16(%arg0: i32, %arg1: i32) -> (i32, i32, i32) {
    %c0_i32 = arith.constant 0 : i32
    %c0_i32_0 = arith.constant 0 : i32
    %c0_i32_1 = arith.constant 0 : i32
    return %arg1, %c0_i32, %c0_i32_0 : i32, i32, i32
  }
  func.func @transform_17(%arg0: i32, %arg1: i32) -> (i32, i32) {
    %c0_i32 = arith.constant 0 : i32
    %c0_i32_0 = arith.constant 0 : i32
    %c0_i32_1 = arith.constant 0 : i32
    return %c0_i32, %c0_i32_0 : i32, i32
  }
  func.func @transform_18(%arg0: i32, %arg1: i32) -> (i32, i32) {
    %c0_i32 = arith.constant 0 : i32
    %c0_i32_0 = arith.constant 0 : i32
    %c0_i32_1 = arith.constant 0 : i32
    return %c0_i32, %c0_i32_0 : i32, i32
  }
  func.func @transform_19(%arg0: i32, %arg1: i32) -> (i32, i32, i32) {
    %c0_i32 = arith.constant 0 : i32
    %c0_i32_0 = arith.constant 0 : i32
    %c0_i32_1 = arith.constant 0 : i32
    return %arg0, %c0_i32, %c0_i32_0 : i32, i32, i32
  }
}

</mosaic_0001>

<bundles_post_ra>
// kernel: dino_teacher_forward.1
= control target key start
LH: loop header
LB: loop body
LE: loop exit
PB: predicated region body
PF: predicated region fallthrough
CT: control target
= control target key end

     0   :  { %s2822_s0 = inlined_call_operand.vmem [shape: bf16[2,24,48], index: 0, kind: input, shape index: {}]   ;;  %s2823_s1 = inlined_call_operand.vmem [shape: bf16[48,32], index: 1, kind: input, shape index: {}]   ;;  %s2824_s2 = inlined_call_operand.vmem [shape: f32[24,32], index: 2, kind: input, shape index: {}]   ;;  %s2825_s3 = inlined_call_operand.vmem [shape: f32[2,1,32], index: 3, kind: input, shape index: {}]   ;;  %s2826_s4 = inlined_call_operand.vmem [shape: f32[2,1,32], index: 4, kind: input, shape index: {}]   ;;  %s2827_s5 = inlined_call_operand.vmem [shape: bf16[2,32,96], index: 5, kind: input, shape index: {}]   ;;  %s2828_s6 = inlined_call_operand.vmem [shape: f32[2,1,96], index: 6, kind: input, shape index: {}]   ;;  %s2829_s7 = inlined_call_operand.vmem [shape: bf16[2,32,32], index: 7, kind: input, shape index: {}]   ;;  %s2830_s8 = inlined_call_operand.vmem [shape: f32[2,1,32], index: 8, kind: input, shape index: {}]   ;;  %s2831_s9 = inlined_call_operand.vmem [shape: f32[2,1,32], index: 9, kind: input, shape index: {}]   ;;  %s2832_s10 = inlined_call_operand.vmem [shape: f32[2,1,32], index: 10, kind: input, shape index: {}]   ;;  %s2833_s11 = inlined_call_operand.vmem [shape: f32[2,1,32], index: 11, kind: input, shape index: {}]   ;;  %s2834_s12 = inlined_call_operand.vmem [shape: bf16[2,32,128], index: 12, kind: input, shape index: {}]   ;;  %s2835_s13 = inlined_call_operand.vmem [shape: f32[2,1,128], index: 13, kind: input, shape index: {}]   ;;  %s2836_s14 = inlined_call_operand.vmem [shape: bf16[2,128,32], index: 14, kind: input, shape index: {}]   ;;  %s2837_s15 = inlined_call_operand.vmem [shape: f32[2,1,32], index: 15, kind: input, shape index: {}]   ;;  %s2838_s16 = inlined_call_operand.vmem [shape: f32[2,1,32], index: 16, kind: input, shape index: {}]   ;;  %s2839_s17 = inlined_call_operand.vmem [shape: f32[1,32], index: 17, kind: input, shape index: {}]   ;;  %s2840_s18 = inlined_call_operand.vmem [shape: f32[1,32], index: 18, kind: input, shape index: {}]   ;;  %s2841_s19 = inlined_call_operand.hbm [shape: f32[2,4,32], index: 19, kind: output, shape index: {}]  }
   0x1   :  { %2859 = sst [smem:[#allocation19_spill]] %s2822_s0 }
   0x2   :  { %2860 = sst [smem:[#allocation20_spill]] %s2823_s1 }
   0x3   :  { %2861 = sst [smem:[#allocation21_spill]] %s2824_s2 }
   0x4   :  { %2862 = sst [smem:[#allocation22_spill]] %s2825_s3 }
   0x5   :  { %2863 = sst [smem:[#allocation23_spill]] %s2826_s4 }
   0x6   :  { %2864 = sst [smem:[#allocation24_spill]] %s2827_s5 }
   0x7   :  { %2865 = sst [smem:[#allocation25_spill]] %s2829_s7 }
   0x8   :  { %2866 = sst [smem:[#allocation26_spill]] %s2838_s16 }
   0x9   :  { %2867 = sst [smem:[#allocation27_spill]] %s2839_s17 }
   0xa   :  { %2868 = sst [smem:[#allocation28_spill]] %s2840_s18 }
   0xb   :  { %2869 = sst [smem:[#allocation29_spill]] %s2841_s19 }
   0xc   :  { %24 = vsyncpa [#allocation4], 0 }
   0xd   :  { %26 = vsyncpa [#allocation4 + $0x1], 0  ;;  %s2405_s0 = smov 0   ;;  %s2407_s30 = smov 0  }
   0xe   :  { %s2409_s20 = smov 0   ;;  %s2411_s21 = smov 0  }
   0xf   :  { %s2413_s1 = smov 0   ;;  %s2415_s22 = smov 0  }
  0x10   :  { %s2417_s2 = smov 0   ;;  %s2419_s23 = smov 0  }
  0x11 LB: > { %2870 = sst [smem:[#allocation6_spill]] %s2267_s0  ;;  %s1920_s24 = sadd.s32 4294967295, %s2295_s23   ;;  %s2295_s23 = sphi %s2419_s23, %s32_s23   ;;  %s2291_s2 = sphi %s2417_s2, %s2922_s2   ;;  %s2287_s22 = sphi %s2415_s22, %s2921_s22   ;;  %s2283_s1 = sphi %s2413_s1, %s2920_s1   ;;  %s2279_s21 = sphi %s2411_s21, %s2919_s21   ;;  %s2275_s20 = sphi %s2409_s20, %s2918_s20   ;;  %s2271_s30 = sphi %s2407_s30, %s2917_s30   ;;  %s2267_s0 = sphi %s2405_s0, %s2916_s0  }
  0x12   : > { %2871 = sst [smem:[#allocation7_spill]] %s2271_s30  ;;  %s1921_s25 = sadd.s32 4294967294, %s2295_s23  }
  0x13   : > { %2872 = sst [smem:[#allocation8_spill]] %s2275_s20  ;;  %s41_s3 = sadd.s32 1, %s2287_s22 }
  0x14   : > { %2873 = sst [smem:[#allocation9_spill]] %s2279_s21  ;;  %p42_p0 = scmp.ge.s32.totalorder %s41_s3, 2 }
  0x15   : > { %2874 = sst [smem:[#allocation10_spill]] %s2283_s1  ;;  %s44_s26 = sadd.s32 1, %s2291_s2 }
  0x16   : > { %2875 = sst [smem:[#allocation11_spill]] %s2287_s22  ;;  %p535_p1 = scmp.ne.s32.totalorder %s2275_s20, %s2271_s30 }
  0x17   : > { %2876 = sst [smem:[#allocation12_spill]] %s2291_s2  ;;  %p536_p2 = scmp.eq.s32.totalorder %s1920_s24, 3 }
  0x18   : > { %2877 = sst [smem:[#allocation13_spill]] %s2295_s23  ;;  %s2924_s3 = smov (%p42_p0, %s41_s3), 0 }
  0x19   : > { %2878 = sst [smem:[#allocation14_spill]] %s2924_s3  ;;  %s2926_s26 = smov (!%p42_p0, %s44_s26), %s2291_s2 }
  0x1a   : > { %p2454_p3 = por %p536_p2, %p535_p1  ;;  %p541_p4 = scmp.ne.s32.totalorder %s2271_s30, %s2267_s0 }
  0x1b   : > { %p46_p5 = scmp.ge.s32.totalorder %s2926_s26, 2  ;;  %p542_p6 = scmp.eq.s32.totalorder %s1921_s25, 3 }
  0x1c   : > { %s2879_s27 = scalar_select %p2454_p3, 1, 0 }
  0x1d   : > { %p1924_p7 = scmp.ge.s32.totalorder %s2295_s23, 1  ;;  %p672_p8 = scmp.lt.s32.totalorder %s2295_s23, 5 }
  0x1e   : > { %2880 = sst [smem:[#allocation15_spill]] %s2879_s27  ;;  %s2928_s26 = smov (%p46_p5, %s2926_s26), 0 }
  0x1f   : > { %2881 = sst [smem:[#allocation16_spill]] %s2928_s26  ;;  %p2464_p9 = por %p542_p6, %p541_p4 }
  0x20   : > { %p673_p10 = pnand %p1924_p7, %p672_p8  ;;  %s522_s29 = ssub.s32 %s2291_s2, %s2928_s26 }
  0x21   : > { %s2882_s28 = scalar_select %p2464_p9, 1, 0 }
  0x22   : > { %s525_s24 = sadd.s32 1, %s2275_s20  ;;  %p523_p11 = scmp.eq.s32.totalorder %s522_s29, 0 }
  0x23   : > { %2883 = sst [smem:[#allocation17_spill]] %s2882_s28  ;;  %676 = sbr.rel (%p673_p10) target bundleno = 2483 (0x9b3), region = 96 }
  0x24   : > { %s2472_s3 = scalar_select %p523_p11, %s2275_s20, %s525_s24  }
  0x25   : > { %s2847_s25 = sand.u32 (!%p673_p10), 1, %s2271_s30   ;;  %p778_p12 = scmp.lt.s32.totalorder (!%p673_p10), %s2283_s1, 1 }
  0x26   : > { %2884 = sst [smem:[#allocation18_spill]] %s2472_s3  ;;  %s2478_s22 = sshll.u32 (!%p673_p10), %s2847_s25, 2 }
  0x27   : > { %p783_p13 = scmp.lt.s32.totalorder (!%p673_p10), %s2279_s21, 1  ;;  %s2887_s30 = sld [smem:[#allocation19_spill]] (!%p673_p10) }
  0x28   : > { %v834_v0 = vlaneseq  ;;  %s779_s26 = scalar_select %p778_p12, %s2283_s1, 1  ;;  %v2297_v2 = vmov -1e+30  }
  0x29   : > { %s2483_s2 = scalar_select %p783_p13, %s2279_s21, 1 }
  0x2a   : > { %v835_v1 = vand.u32 127, %v834_v0  ;;  %s2054_s29 = smul.u32 12, %s779_s26  ;;  %s2888_s5 = sld [smem:[#allocation24_spill]] }
  0x2b   : > { %s2029_s26 = sshll.u32 %s2483_s2, 4  ;;  %s2889_s7 = sld [smem:[#allocation25_spill]] }
  0x2c   : > { %vm836_vm0 = vcmp.lt.s32.totalorder %v835_v1, 17  ;;  %s2532_s24 = scalar_lea.vmem %s2834_s12, %s2029_s26  ;;  %s2032_s19 = sshll.u32 %s2483_s2, 6 }
  0x2d   : > { %v2485_v3 = vsel %vm836_vm0, 0.0, %v2297_v2  ;;  %s782_s1 = scalar_lea.vmem %s2887_s30, %s2054_s29  ;;  %s2542_s29 = scalar_lea.vmem %s2836_s14, %s2032_s19 }
  0x2e   : > { %s829_s4 = scalar_lea.vmem %s2837_s15, %s2483_s2  ;;  %s2891_s20 = sld [smem:[#allocation9_spill]] }
  0x30   : > { %s2502_s21 = scalar_lea.vmem %s2888_s5, %s2029_s26  ;;  %s2890_s5 = sld [smem:[#allocation26_spill]] }
  0x31   : > { %s2511_s0 = scalar_lea.vmem %s2889_s7, %s2029_s26  ;;  %s777_s26 = scalar_lea.vmem [#allocation3], %s2478_s22 }
  0x34   : > { %p1935_p0 = scmp.ne.s32.totalorder %s2891_s20, 0 }
  0x35   : > { %s2892_s28 = sld [smem:[#allocation20_spill]] (!%p1935_p0) }
  0x36   : > { %s832_s3 = scalar_lea.vmem %s2890_s5, %s2483_s2  ;;  %841 = sbr.rel (%p1935_p0) target bundleno = 208 (0xd0), region = 100 }
  0x37   : > { %s2893_s18 = sld [smem:[#allocation21_spill]] (!%p1935_p0) }
  0x3b   : > { %v2036_v4 = vld [vmem:[%s2892_s28 + $0x10] sm:$0xff]  ;;  %v2035_v5 = vld [vmem:[%s2892_s28 + $0x8] sm:$0xff]  ;;  %v2034_v8 = vld [vmem:[%s2892_s28] sm:$0xff]  ;;  %vm880_vm1 = vcmask 392192   ;;  %vm905_vm2 = vcmask 261120  }
  0x3c   : > { %892 = vmatpush.bf16.msra.mxu0 %v2036_v4  ;;  %2051 = vmatpush.bf16.msra.mxu1 %v2036_v4  ;;  %v844_v6 = vld [vmem:[%s782_s1 + $0x8] sm:$0xf]  ;;  %v2033_v9 = vld [vmem:[%s782_s1] sm:$0xff] }
  0x3d   : > { %v859_v7 = vunpack.c.l.b16 %v844_v6  ;;  %v851_v11 = vld [vmem:[%s2893_s18] sm:$0xff]  ;;  %v853_v12 = vld [vmem:[%s2893_s18 + $0x10] sm:$0xff]  ;;  %v852_v17 = vld [vmem:[%s2893_s18 + $0x8] sm:$0xff] }
  0x3f   : > { %v861_v10 = vpack.c.b16 %v859_v7, %v859_v7 }
  0x40   : > { %893 = vmatpush.bf16.msra.mxu0 %v2035_v5  ;;  %2052 = vmatpush.bf16.msra.mxu1 %v2035_v5 }
  0x44   : > { %894 = vmatpush.bf16.msra.mxu0 %v2034_v8  ;;  %2053 = vmatpush.bf16.msra.mxu1 %v2034_v8 }
  0x47   : > { %1952 = vmatmul.msk.bf16.vlgmr.msra.gmra.mxu0 %vm880_vm1, %v2033_v9  ;;  %1953 = vmatmul.msk.bf16.vlgmr.msra.gmra.mxu1 %vm880_vm1, %v861_v10 }
  0xc4   : > { %v896_v13 = vpop.f32.mrf.mxu0  ;;  %v901_v14 = vpop.f32.mrf.mxu1 }
  0xc5   : > { %v897_v15 = vadd.f32 %v896_v13, %v851_v11  ;;  %v902_v16 = vadd.f32 %v901_v14, %v853_v12 }
  0xc7   : > { %906 = vst.msk [vmem:[#allocation2] sm:$0xff] %vm905_vm2, %v897_v15 }
  0xc8   : > { %908 = vst.msk [vmem:[#allocation2 + $0x10] sm:$0xff] %vm905_vm2, %v902_v16 }
  0xcc   : > { %v898_v18 = vpop.f32.mrf.mxu0  ;;  %v903_v19 = vpop.f32.mrf.mxu1 }
  0xcd   : > { %v899_v20 = vadd.f32 %v898_v18, %v852_v17 }
  0xcf   : > { %907 = vst.msk [vmem:[#allocation2 + $0x8] sm:$0xff] %vm905_vm2, %v899_v20 }
  0xd0 PF: > { %v2572_v21 = vld [vmem:[#allocation2] sm:$0xff]  ;;  %vm914_vm3 = vcmask 261120   ;;  %v2574_v22 = vld [vmem:[#allocation2 + $0x10] sm:$0xff]  ;;  %v2298_v27 = vmov 32.0   ;;  %v2038_v49 = vld [vmem:[%s2502_s21 + $0x8] sm:$0xff]  ;;  %s2894_s19 = sld [smem:[#allocation22_spill]]  ;;  %s2898_s1 = scalar_lea.vmem %s2828_s6, %s2483_s2 }
  0xd1   : > { %v915_v23 = vsel %vm914_vm3, %v2572_v21, 0.0  ;;  %v921_v24 = vsel %vm914_vm3, %v2574_v22, 0.0  ;;  %2149 = vrcp.f32 %v2298_v27  ;;  %1034 = vmatpush.bf16.msra.mxu0 %v2038_v49  ;;  %v2037_v52 = vld [vmem:[%s2502_s21] sm:$0xff]  ;;  %s2896_s27 = sld [smem:[#allocation23_spill]]  ;;  %s2299_s7 = smov 112   ;;  %vm1054_vm14 = vcmask 130048  }
  0xd2   : > { %916 = vadd.xlane.f32.xlu0 %v915_v23  ;;  %922 = vadd.xlane.f32.xlu1 %v921_v24  ;;  %s2300_s21 = smov 80   ;;  %s2301_s23 = smov 96   ;;  %vm1091_vm15 = vcmask 195584   ;;  %vm1138_vm0 = vcmask 1043456  }
  0xd3   : > { %s2304_s25 = smov 16   ;;  %s2900_s20 = scalar_lea.vmem %s2831_s9, %s2483_s2 }
  0xd4   : > { %s2903_s5 = scalar_lea.vmem %s2835_s13, %s2483_s2 }
  0xd5   : > { %1035 = vmatpush.bf16.msra.mxu0 %v2037_v52 }
  0xd6   : > { %v2580_v25 = vld [vmem:[#allocation2 + $0x8] sm:$0xff]  ;;  %s2895_s30 = scalar_lea.vmem %s2894_s19, %s2483_s2  ;;  %s2302_s19 = smov 48  }
  0xd7   : > { %v918_v26 = vsel %vm914_vm3, %v2580_v25, 0.0  ;;  %v2150_v28 = vpop.eup %2149  ;;  %v2139_v11 = vld [vmem:[%s2895_s30] ss:$0 sm:$0xff]  ;;  %s2897_s17 = scalar_lea.vmem %s2896_s27, %s2483_s2  ;;  %s2303_s30 = smov 64  }
  0xd8   : > { %v925_v29 = vmul.f32 32.0, %v2150_v28  ;;  %vm929_vm4 = vweird.f32 %v2150_v28  ;;  %v2140_v18 = vld [vmem:[%s2897_s17] ss:$0 sm:$0xff] }
  0xda   : > { %919 = vadd.xlane.f32.xlu0 %v918_v26  ;;  %v926_v30 = vsub.f32 1.0, %v925_v29 }
  0xdc   : > { %v927_v31 = vmul.f32 %v2150_v28, %v926_v30 }
  0xde   : > { %v928_v32 = vadd.f32 %v2150_v28, %v927_v31 }
  0xe0   : > { %v2584_v33 = vsel %vm929_vm4, %v2150_v28, %v928_v32 }
 0x145   : > { %v917_v34 = vpop.xlane.xlu0 %916  ;;  %v923_v38 = vpop.xlane.xlu1 %922 }
 0x146   : > { %v931_v35 = vmul.f32 %v2584_v33, %v917_v34  ;;  %v933_v42 = vmul.f32 %v2584_v33, %v923_v38 }
 0x148   : > { %v934_v36 = vsub.f32 %v2572_v21, %v931_v35  ;;  %v2593_v44 = vsub.f32 %v2574_v22, %v933_v42 }
 0x14a   : > { %v937_v37 = vmul.f32 %v934_v36, %v934_v36  ;;  %v939_v47 = vmul.f32 %v2593_v44, %v2593_v44 }
 0x14c   : > { %v940_v39 = vsel %vm914_vm3, %v937_v37, 0.0  ;;  %v946_v48 = vsel %vm914_vm3, %v939_v47, 0.0 }
 0x14d   : > { %941 = vadd.xlane.f32.xlu1 %v940_v39  ;;  %v920_v40 = vpop.xlane.xlu0 %919 }
 0x14e   : > { %v932_v41 = vmul.f32 %v2584_v33, %v920_v40 }
 0x150   : > { %v935_v43 = vsub.f32 %v2580_v25, %v932_v41 }
 0x152   : > { %v938_v45 = vmul.f32 %v935_v43, %v935_v43 }
 0x154   : > { %v943_v46 = vsel %vm914_vm3, %v938_v45, 0.0 }
 0x155   : > { %944 = vadd.xlane.f32.xlu2 %v943_v46 }
 0x15d   : > { %947 = vadd.xlane.f32.xlu2 %v946_v48 }
 0x1c0   : > { %v942_v50 = vpop.xlane.xlu1 %941 }
 0x1c1   : > { %v949_v51 = vmul.f32 %v942_v50, %v2584_v33 }
 0x1c3   : > { %v952_v53 = vadd.f32 1e-06, %v949_v51 }
 0x1c5   : > { %2151 = vrsqrt.f32 %v952_v53  ;;  %vm961_vm6 = vweird.f32 %v952_v53 }
 0x1c8   : > { %v945_v54 = vpop.xlane.xlu2 %944 }
 0x1c9   : > { %v950_v55 = vmul.f32 %v945_v54, %v2584_v33 }
 0x1cb   : > { %v2152_v56 = vpop.eup %2151  ;;  %v953_v57 = vadd.f32 1e-06, %v950_v55 }
 0x1cc   : > { %v956_v58 = vmul.f32 %v2152_v56, %v952_v53  ;;  %vm962_vm5 = vweird.f32 %v2152_v56 }
 0x1cd   : > { %2153 = vrsqrt.f32 %v953_v57  ;;  %vm963_vm7 = vmor %vm961_vm6, %vm962_vm5  ;;  %vm971_vm9 = vweird.f32 %v953_v57 }
 0x1ce   : > { %v957_v59 = vmul.f32 %v2152_v56, %v956_v58 }
 0x1d0   : > { %v958_v60 = vmul.f32 0.5, %v957_v59  ;;  %v948_v61 = vpop.xlane.xlu2 %947 }
 0x1d1   : > { %v951_v62 = vmul.f32 %v948_v61, %v2584_v33 }
 0x1d2   : > { %v959_v63 = vsub.f32 1.5, %v958_v60 }
 0x1d3   : > { %v2154_v0 = vpop.eup %2153  ;;  %v954_v1 = vadd.f32 1e-06, %v951_v62 }
 0x1d4   : > { %v960_v2 = vmul.f32 %v2152_v56, %v959_v63  ;;  %v966_v4 = vmul.f32 %v2154_v0, %v953_v57  ;;  %vm972_vm8 = vweird.f32 %v2154_v0 }
 0x1d5   : > { %2155 = vrsqrt.f32 %v954_v1  ;;  %vm973_vm10 = vmor %vm971_vm9, %vm972_vm8  ;;  %vm981_vm11 = vweird.f32 %v954_v1 }
 0x1d6   : > { %v967_v5 = vmul.f32 %v2154_v0, %v966_v4  ;;  %v964_v6 = vsel %vm963_vm7, %v2152_v56, %v960_v2 }
 0x1d7   : > { %v985_v10 = vmul.f32 %v964_v6, %v934_v36  ;;  %v2141_v36 = vld [vmem:[%s2898_s1] ss:$0 sm:$0xff] }
 0x1d8   : > { %v968_v7 = vmul.f32 0.5, %v967_v5 }
 0x1d9   : > { %v991_v17 = vmul.f32 %v2139_v11, %v985_v10 }
 0x1da   : > { %v969_v8 = vsub.f32 1.5, %v968_v7 }
 0x1db   : > { %v2156_v9 = vpop.eup %2155  ;;  %v997_v24 = vadd.f32 %v2140_v18, %v991_v17 }
 0x1dc   : > { %v970_v12 = vmul.f32 %v2154_v0, %v969_v8  ;;  %v976_v13 = vmul.f32 %v2156_v9, %v954_v1  ;;  %vm982_vm12 = vweird.f32 %v2156_v9 }
 0x1dd   : > { %vm983_vm13 = vmor %vm981_vm11, %vm982_vm12 }
 0x1de   : > { %v974_v14 = vsel %vm973_vm10, %v2154_v0, %v970_v12  ;;  %v977_v15 = vmul.f32 %v2156_v9, %v976_v13 }
 0x1df   : > { %v986_v16 = vmul.f32 %v974_v14, %v935_v43 }
 0x1e0   : > { %v978_v19 = vmul.f32 0.5, %v977_v15 }
 0x1e1   : > { %v992_v20 = vmul.f32 %v2139_v11, %v986_v16 }
 0x1e2   : > { %v979_v23 = vsub.f32 1.5, %v978_v19 }
 0x1e3   : > { %v998_v26 = vadd.f32 %v2140_v18, %v992_v20 }
 0x1e4   : > { %v980_v27 = vmul.f32 %v2156_v9, %v979_v23 }
 0x1e5   : > { %v1000_v28 = vpack.c.bf16 %v998_v26, %v997_v24 }
 0x1e6   : > { %v984_v29 = vsel %vm983_vm13, %v2156_v9, %v980_v27 }
 0x1e7   : > { %1962 = vmatmul.msk.bf16.vlgmr.msra.gmra.mxu0 %vm914_vm3, %v1000_v28  ;;  %v987_v30 = vmul.f32 %v984_v29, %v2593_v44 }
 0x1e9   : > { %v993_v31 = vmul.f32 %v2139_v11, %v987_v30 }
 0x1eb   : > { %v999_v32 = vadd.f32 %v2140_v18, %v993_v31 }
 0x1ed   : > { %v1001_v34 = vpack.c.bf16 %v999_v32, %v999_v32 }
 0x1f7   : > { %1963 = vmatmul.msk.bf16.gmra.mxu0 %vm914_vm3, %v1001_v34 }
 0x264   : > { %v1037_v35 = vpop.f32.mrf.mxu0 }
 0x265   : > { %v1038_v38 = vadd.f32 %v2141_v36, %v1037_v35 }
 0x26c   : > { %v1039_v37 = vpop.f32.mrf.mxu0 }
 0x26d   : > { %v1040_v39 = vadd.f32 %v2141_v36, %v1039_v37 }
 0x26f   : > { %v2622_v40 = vpack.c.bf16 %v1040_v39, %v1038_v38 }
 0x271   : > { %1160 = vrot.lane.b32.xlu2 %v2622_v40, %s2299_s7  ;;  %1164 = vrot.lane.b32.xlu1 %v2622_v40, %s2300_s21 }
 0x274   : > { %v1042_v41 = vpop.f32.mrf.mxu0 }
 0x275   : > { %v1043_v42 = vadd.f32 %v2141_v36, %v1042_v41 }
 0x277   : > { %v1047_v43 = vpack.c.bf16 %v1043_v42, %v1043_v42 }
 0x279   : > { %1050 = vrot.lane.b32.xlu2 %v2622_v40, %s2301_s23  ;;  %1162 = vrot.lane.b32.xlu1 %v1047_v43, %s2299_s7  ;;  %s2901_s7 = scalar_lea.vmem %s2832_s10, %s2483_s2 }
 0x27a   : > { %1166 = vrot.lane.b32.xlu0 %v1047_v43, %s2300_s21 }
 0x27c   : > { %v1044_v44 = vpop.f32.mrf.mxu0 }
 0x282   : > { %1052 = vrot.lane.b32.xlu0 %v1047_v43, %s2301_s23 }
 0x2cb   : > { %v1161_v47 = vpop.permute.xlu2 %1160 }
 0x2d3   : > { %v1051_v52 = vpop.permute.xlu2 %1050 }
 0x2d4   : > { %v1062_v53 = vsel %vm1054_vm14, %v1051_v52, 0 }
 0x2e3   : > { %v1165_v48 = vpop.permute.xlu1 %1164 }
 0x2e4   : > { %v1175_v51 = vsel %vm1054_vm14, %v1165_v48, 0 }
 0x2eb   : > { %v1163_v54 = vpop.permute.xlu1 %1162 }
 0x2ec   : > { %v1167_v45 = vpop.permute.xlu0 %1166 }
 0x2ed   : > { %v1178_v46 = vsel %vm1054_vm14, %v1167_v45, 0 }
 0x2ee   : > { %1186 = vmatpush.bf16.xpose.msra.mxu3 %v1178_v46 }
 0x2f4   : > { %v1053_v49 = vpop.permute.xlu0 %1052 }
 0x2f5   : > { %v1065_v50 = vsel %vm1054_vm14, %v1053_v49, 0 }
 0x2f6   : > { %1073 = vmatpush.bf16.xpose.msra.mxu1 %v1065_v50  ;;  %1187 = vmatpush.bf16.xpose.msra.mxu3 %v1175_v51 }
 0x2fd   : > { %1968 = vmatmul.msk.bf16.vlgmr.msra.gmra.mxu3 %vm1054_vm14, %v1161_v47 }
 0x2fe   : > { %1074 = vmatpush.bf16.xpose.msra.mxu1 %v1062_v53 }
 0x305   : > { %1964 = vmatmul.msk.bf16.vlgmr.msra.gmra.mxu1 %vm1054_vm14, %v2622_v40 }
 0x30d   : > { %1969 = vmatmul.msk.bf16.gmra.mxu3 %vm1054_vm14, %v1163_v54 }
 0x315   : > { %1965 = vmatmul.msk.bf16.gmra.mxu1 %vm1054_vm14, %v1047_v43 }
 0x380   : > { %v1189_v55 = vpop.f32.mrf.mxu3 }
 0x381   : > { %v1198_v56 = vmul.f32 0.25, %v1189_v55 }
 0x382   : > { %v1076_v57 = vpop.f32.mrf.mxu1 }
 0x383   : > { %v1201_v58 = vadd.f32 %v1198_v56, %v2485_v3  ;;  %v1085_v59 = vmul.f32 0.25, %v1076_v57 }
 0x385   : > { %v1088_v60 = vadd.f32 %v1085_v59, %v2485_v3  ;;  %v1204_v61 = vsel %vm1091_vm15, %v1201_v58, -inf }
 0x386   : > { %1205 = vmax.xlane.f32.xlu0 %v1204_v61 }
 0x387   : > { %v1092_v62 = vsel %vm1091_vm15, %v1088_v60, -inf }
 0x388   : > { %v1191_v63 = vpop.f32.mrf.mxu3  ;;  %1093 = vmax.xlane.f32.xlu1 %v1092_v62 }
 0x389   : > { %v1199_v0 = vmul.f32 0.25, %v1191_v63 }
 0x38a   : > { %v1078_v1 = vpop.f32.mrf.mxu1 }
 0x38b   : > { %v1202_v2 = vadd.f32 %v1199_v0, %v2485_v3  ;;  %v1086_v4 = vmul.f32 0.25, %v1078_v1 }
 0x38d   : > { %v1089_v5 = vadd.f32 %v1086_v4, %v2485_v3  ;;  %v1207_v6 = vsel %vm1091_vm15, %v1202_v2, -inf }
 0x38e   : > { %1208 = vmax.xlane.f32.xlu2 %v1207_v6 }
 0x38f   : > { %v1095_v7 = vsel %vm1091_vm15, %v1089_v5, -inf }
 0x390   : > { %v1194_v8 = vpop.f32.mrf.mxu3  ;;  %1096 = vmax.xlane.f32.xlu0 %v1095_v7 }
 0x391   : > { %v1200_v9 = vmul.f32 0.25, %v1194_v8 }
 0x392   : > { %v1081_v10 = vpop.f32.mrf.mxu1 }
 0x393   : > { %v1203_v11 = vadd.f32 %v1200_v9, %v2485_v3  ;;  %v1087_v12 = vmul.f32 0.25, %v1081_v10 }
 0x395   : > { %v1090_v13 = vadd.f32 %v1087_v12, %v2485_v3  ;;  %v1210_v14 = vsel %vm1091_vm15, %v1203_v11, -inf }
 0x396   : > { %1211 = vmax.xlane.f32.xlu2 %v1210_v14 }
 0x397   : > { %v1098_v15 = vsel %vm1091_vm15, %v1090_v13, -inf }
 0x398   : > { %v1196_v16 = vpop.f32.mrf.mxu3  ;;  %1099 = vmax.xlane.f32.xlu0 %v1098_v15 }
 0x39a   : > { %v1083_v17 = vpop.f32.mrf.mxu1 }
 0x3ae   : > { %1241 = vrot.lane.b32.xlu2 %v1047_v43, %s2302_s19 }
 0x3b6   : > { %1129 = vrot.lane.b32.xlu2 %v1047_v43, %s2303_s30 }
 0x3f9   : > { %v1206_v18 = vpop.xlane.xlu0 %1205 }
 0x3fa   : > { %v1213_v19 = vsub.f32 %v1201_v58, %v1206_v18 }
 0x3fb   : > { %v1094_v20 = vpop.xlane.xlu1 %1093 }
 0x3fc   : > { %v1216_v23 = vmul.f32 1.442695, %v1213_v19  ;;  %v1101_v24 = vsub.f32 %v1088_v60, %v1094_v20 }
 0x3fe   : > { %2157 = vpow2.f32 %v1216_v23  ;;  %v1104_v3 = vmul.f32 1.442695, %v1101_v24  ;;  %v2040_v23 = vld [vmem:[%s2511_s0 + $0x8] sm:$0xff] }
 0x400   : > { %2159 = vpow2.f32 %v1104_v3 }
 0x401   : > { %v1209_v26 = vpop.xlane.xlu2 %1208 }
 0x402   : > { %v1214_v32 = vsub.f32 %v1202_v2, %v1209_v26 }
 0x403   : > { %v1097_v27 = vpop.xlane.xlu0 %1096 }
 0x404   : > { %v2158_v28 = vpop.eup %2157  ;;  %v1102_v29 = vsub.f32 %v1089_v5, %v1097_v27  ;;  %v1218_v37 = vmul.f32 1.442695, %v1214_v32 }
 0x405   : > { %v1222_v30 = vsel %vm1091_vm15, %v2158_v28, 0.0 }
 0x406   : > { %v2160_v31 = vpop.eup %2159  ;;  %v1106_v34 = vmul.f32 1.442695, %v1102_v29  ;;  %1223 = vadd.xlane.f32.xlu1 %v1222_v30 }
 0x407   : > { %v1110_v35 = vsel %vm1091_vm15, %v2160_v31, 0.0 }
 0x408   : > { %2161 = vpow2.f32 %v1106_v34  ;;  %1111 = vadd.xlane.f32.xlu0 %v1110_v35 }
 0x409   : > { %v1212_v36 = vpop.xlane.xlu2 %1211  ;;  %2163 = vpow2.f32 %v1218_v37 }
 0x40a   : > { %v1215_v52 = vsub.f32 %v1203_v11, %v1212_v36 }
 0x40b   : > { %v1100_v38 = vpop.xlane.xlu0 %1099 }
 0x40c   : > { %v1103_v39 = vsub.f32 %v1090_v13, %v1100_v38  ;;  %v1220_v53 = vmul.f32 1.442695, %v1215_v52 }
 0x40e   : > { %v2162_v41 = vpop.eup %2161  ;;  %v1108_v42 = vmul.f32 1.442695, %v1103_v39 }
 0x40f   : > { %v1113_v43 = vsel %vm1091_vm15, %v2162_v41, 0.0  ;;  %v2164_v46 = vpop.eup %2163 }
 0x410   : > { %2165 = vpow2.f32 %v1108_v42  ;;  %1114 = vadd.xlane.f32.xlu0 %v1113_v43  ;;  %v1225_v49 = vsel %vm1091_vm15, %v2164_v46, 0.0 }
 0x411   : > { %v1242_v44 = vpop.permute.xlu2 %1241  ;;  %2167 = vpow2.f32 %v1220_v53 }
 0x412   : > { %v1251_v45 = vsel %vm1138_vm0, %v1242_v44, 0 }
 0x413   : > { %1259 = vmatpush.bf16.msrb.mxu0 %v1251_v45 }
 0x416   : > { %v2166_v47 = vpop.eup %2165 }
 0x417   : > { %v1116_v48 = vsel %vm1091_vm15, %v2166_v47, 0.0  ;;  %v2168_v54 = vpop.eup %2167 }
 0x418   : > { %1117 = vadd.xlane.f32.xlu2 %v1116_v48  ;;  %1226 = vadd.xlane.f32.xlu0 %v1225_v49  ;;  %v1228_v55 = vsel %vm1091_vm15, %v2168_v54, 0.0 }
 0x419   : > { %v1130_v50 = vpop.permute.xlu2 %1129 }
 0x41a   : > { %v1140_v51 = vsel %vm1138_vm0, %v1130_v50, 0 }
 0x41b   : > { %1148 = vmatpush.bf16.msra.mxu2 %v1140_v51 }
 0x41f   : > { %1239 = vrot.lane.b32.xlu1 %v2622_v40, %s2302_s19  ;;  %s2902_s19 = scalar_lea.vmem %s2833_s11, %s2483_s2 }
 0x42c   : > { %1127 = vrot.lane.b32.xlu0 %v2622_v40, %s2303_s30 }
 0x449   : > { %1229 = vadd.xlane.f32.xlu1 %v1228_v55 }
 0x479   : > { %v1224_v58 = vpop.xlane.xlu1 %1223 }
 0x47a   : > { %2169 = vrcp.f32 %v1224_v58 }
 0x47b   : > { %v1112_v56 = vpop.xlane.xlu0 %1111 }
 0x480   : > { %v2170_v60 = vpop.eup %2169 }
 0x481   : > { %v1234_v63 = vmul.f32 %v2170_v60, %v2158_v28  ;;  %v2039_v28 = vld [vmem:[%s2511_s0] sm:$0xff]  ;;  %s2899_s0 = scalar_lea.vmem %s2830_s8, %s2483_s2  ;;  %s2905_s2 = sld [smem:[#allocation9_spill]] }
 0x482   : > { %v2142_v39 = vld [vmem:[%s2899_s0] ss:$0 sm:$0xff] }
 0x483   : > { %v1115_v57 = vpop.xlane.xlu0 %1114 }
 0x487   : > { %p2024_p1 = scmp.ne.s32.totalorder %s2905_s2, 1 }
 0x48b   : > { %v1227_v59 = vpop.xlane.xlu0 %1226  ;;  %v1118_v7 = vpop.xlane.xlu2 %1117 }
 0x48c   : > { %2171 = vrcp.f32 %v1227_v59 }
 0x48d   : > { %2173 = vrcp.f32 %v1115_v57 }
 0x48e   : > { %2175 = vrcp.f32 %v1112_v56 }
 0x48f   : > { %2177 = vrcp.f32 %v1118_v7 }
 0x491   : > { %v1240_v61 = vpop.permute.xlu1 %1239 }
 0x492   : > { %v2172_v62 = vpop.eup %2171  ;;  %1260 = vmatpush.bf16.msrb.mxu0 %v1240_v61 }
 0x493   : > { %v1235_v40 = vmul.f32 %v2172_v62, %v2164_v46  ;;  %v2174_v1 = vpop.eup %2173 }
 0x494   : > { %v2176_v2 = vpop.eup %2175  ;;  %v1123_v4 = vmul.f32 %v2174_v1, %v2162_v41  ;;  %v2143_v41 = vld [vmem:[%s2900_s20] ss:$0 sm:$0xff]  ;;  %s2906_s20 = sld [smem:[#allocation27_spill]] (!%p2024_p1) }
 0x495   : > { %v1237_v0 = vpack.c.bf16 %v1235_v40, %v1234_v63  ;;  %v1122_v6 = vmul.f32 %v2176_v2, %v2160_v31  ;;  %v2178_v9 = vpop.eup %2177 }
 0x496   : > { %v1124_v10 = vmul.f32 %v2178_v9, %v2166_v47  ;;  %v2041_v9 = vld [vmem:[%s2532_s24] sm:$0xff] }
 0x497   : > { %1970 = vmatmul.msk.bf16.vlgmr.msrb.gmra.mxu0 %vm1091_vm15, %v1237_v0  ;;  %v1125_v8 = vpack.c.bf16 %v1123_v4, %v1122_v6  ;;  %v2042_v6 = vld [vmem:[%s2532_s24 + $0x8] sm:$0xff] }
 0x498   : > { %v1126_v11 = vpack.c.bf16 %v1124_v10, %v1124_v10  ;;  %1456 = vmatpush.bf16.msrb.mxu1 %v2042_v6 }
 0x49c   : > { %1457 = vmatpush.bf16.msrb.mxu1 %v2041_v9 }
 0x49e   : > { %v1128_v5 = vpop.permute.xlu0 %1127 }
 0x49f   : > { %1149 = vmatpush.bf16.msra.mxu2 %v1128_v5 }
 0x4a2   : > { %1966 = vmatmul.msk.bf16.vlgmr.msra.gmra.mxu2 %vm1091_vm15, %v1125_v8 }
 0x4a3   : > { %1320 = vmatpush.bf16.msrb.mxu2 %v2040_v23 }
 0x4a7   : > { %1321 = vmatpush.bf16.msrb.mxu2 %v2039_v28 }
 0x4b2   : > { %1967 = vmatmul.msk.bf16.gmra.mxu2 %vm1091_vm15, %v1126_v11 }
 0x4bc   : > { %v1230_v12 = vpop.xlane.xlu1 %1229 }
 0x4bd   : > { %2179 = vrcp.f32 %v1230_v12 }
 0x4c3   : > { %v2180_v13 = vpop.eup %2179 }
 0x4c4   : > { %v1236_v14 = vmul.f32 %v2180_v13, %v2168_v54 }
 0x4c6   : > { %v1238_v15 = vpack.c.bf16 %v1236_v14, %v1236_v14 }
 0x4c8   : > { %1971 = vmatmul.msk.bf16.gmra.mxu0 %vm1091_vm15, %v1238_v15 }
 0x514   : > { %v1262_v16 = vpop.f32.mrf.mxu0 }
 0x51c   : > { %v1264_v17 = vpop.f32.mrf.mxu0 }
 0x51d   : > { %v2134_v18 = vpack.i.bf16 %v1264_v17, %v1262_v16 }
 0x51f   : > { %2135 = vrot.lane.b32.xlu0 %v2134_v18, %s2304_s25 }
 0x525   : > { %v1151_v19 = vpop.f32.mrf.mxu2 }
 0x52d   : > { %v1153_v20 = vpop.f32.mrf.mxu2 }
 0x535   : > { %v1156_v24 = vpop.f32.mrf.mxu2 }
 0x53d   : > { %v1158_v3 = vpop.f32.mrf.mxu2 }
 0x545   : > { %v1267_v26 = vpop.f32.mrf.mxu0 }
 0x546   : > { %1278 = vrot.lane.b32.xlu0 %v1267_v26, %s2304_s25 }
 0x54d   : > { %v1269_v27 = vpop.f32.mrf.mxu0 }
 0x591   : > { %v2136_v29 = vpop.permute.xlu0 %2135 }
 0x592   : > { %v2138_v30 = vunpack.i.h.bf16 %v2136_v29  ;;  %v2137_v31 = vunpack.i.l.bf16 %v2136_v29  ;;  %v2144_v29 = vld [vmem:[%s2901_s7] ss:$0 sm:$0xff]  ;;  %s2907_s7 = sld [smem:[#allocation28_spill]] (!%p2024_p1) }
 0x594   : > { %v1283_v32 = vsel %vm1054_vm14, %v1151_v19, %v2137_v31  ;;  %v1284_v34 = vsel %vm1054_vm14, %v1153_v20, %v2138_v30 }
 0x595   : > { %v1286_v35 = vpack.c.bf16 %v1284_v34, %v1283_v32 }
 0x597   : > { %1980 = vmatmul.msk.bf16.vlgmr.msrb.gmra.mxu2 %vm914_vm3, %v1286_v35  ;;  %v2145_v35 = vld [vmem:[%s2902_s19] ss:$0 sm:$0xff] }
 0x5b8   : > { %v1279_v36 = vpop.permute.xlu0 %1278 }
 0x5b9   : > { %v1285_v37 = vsel %vm1054_vm14, %v1156_v24, %v1279_v36 }
 0x5ba   : > { %v1287_v38 = vpack.c.bf16 %v1285_v37, %v1285_v37 }
 0x5bc   : > { %1981 = vmatmul.msk.bf16.gmra.mxu2 %vm914_vm3, %v1287_v38 }
 0x61a   : > { %v1323_v42 = vpop.f32.mrf.mxu2 }
 0x61b   : > { %v1324_v43 = vadd.f32 %v2142_v39, %v1323_v42 }
 0x61d   : > { %v1336_v44 = vmul.f32 %v2143_v41, %v1324_v43 }
 0x61f   : > { %v2684_v45 = vadd.f32 %v1336_v44, %v2572_v21 }
 0x621   : > { %v1344_v46 = vsel %vm914_vm3, %v2684_v45, 0.0 }
 0x622   : > { %v1325_v47 = vpop.f32.mrf.mxu2  ;;  %1345 = vadd.xlane.f32.xlu0 %v1344_v46 }
 0x623   : > { %v1326_v48 = vadd.f32 %v2142_v39, %v1325_v47 }
 0x625   : > { %v1337_v49 = vmul.f32 %v2143_v41, %v1326_v48 }
 0x627   : > { %v2689_v50 = vadd.f32 %v1337_v49, %v2580_v25 }
 0x629   : > { %v1347_v51 = vsel %vm914_vm3, %v2689_v50, 0.0 }
 0x62a   : > { %1348 = vadd.xlane.f32.xlu1 %v1347_v51 }
 0x63f   : > { %v1328_v52 = vpop.f32.mrf.mxu2 }
 0x640   : > { %v1329_v53 = vadd.f32 %v2142_v39, %v1328_v52 }
 0x642   : > { %v1338_v54 = vmul.f32 %v2143_v41, %v1329_v53 }
 0x644   : > { %v2694_v21 = vadd.f32 %v1338_v54, %v2574_v22 }
 0x646   : > { %v1350_v55 = vsel %vm914_vm3, %v2694_v21, 0.0 }
 0x647   : > { %v1330_v56 = vpop.f32.mrf.mxu2  ;;  %1351 = vadd.xlane.f32.xlu2 %v1350_v55 }
 0x695   : > { %v1346_v57 = vpop.xlane.xlu0 %1345 }
 0x696   : > { %v1353_v58 = vmul.f32 %v1346_v57, %v2584_v33  ;;  %v2050_v57 = vld [vmem:[%s2542_s29 + $0x38] sm:$0xff] }
 0x697   : > { %1565 = vmatpush.bf16.msrb.mxu3 %v2050_v57 }
 0x698   : > { %v1356_v25 = vsub.f32 %v2684_v45, %v1353_v58  ;;  %v2049_v58 = vld [vmem:[%s2542_s29 + $0x30] sm:$0xff] }
 0x69a   : > { %v1359_v59 = vmul.f32 %v1356_v25, %v1356_v25 }
 0x69b   : > { %1566 = vmatpush.bf16.msrb.mxu3 %v2049_v58 }
 0x69c   : > { %v1362_v60 = vsel %vm914_vm3, %v1359_v59, 0.0  ;;  %v2047_v59 = vld [vmem:[%s2542_s29 + $0x20] sm:$0xff] }
 0x69d   : > { %v1349_v61 = vpop.xlane.xlu1 %1348  ;;  %1363 = vadd.xlane.f32.xlu1 %v1362_v60  ;;  %v2046_v60 = vld [vmem:[%s2542_s29 + $0x18] sm:$0xff] }
 0x69e   : > { %v1354_v22 = vmul.f32 %v1349_v61, %v2584_v33  ;;  %v2045_v61 = vld [vmem:[%s2542_s29 + $0x10] sm:$0xff] }
 0x6a0   : > { %v1357_v62 = vsub.f32 %v2689_v50, %v1354_v22  ;;  %v2044_v22 = vld [vmem:[%s2542_s29 + $0x8] sm:$0xff] }
 0x6a2   : > { %v1360_v63 = vmul.f32 %v1357_v62, %v1357_v62 }
 0x6a4   : > { %v1365_v40 = vsel %vm914_vm3, %v1360_v63, 0.0 }
 0x6a5   : > { %1366 = vadd.xlane.f32.xlu2 %v1365_v40  ;;  %v2043_v40 = vld [vmem:[%s2542_s29] sm:$0xff] }
 0x6ba   : > { %v1352_v0 = vpop.xlane.xlu2 %1351 }
 0x6bb   : > { %v1355_v1 = vmul.f32 %v1352_v0, %v2584_v33 }
 0x6bd   : > { %v1358_v2 = vsub.f32 %v2694_v21, %v1355_v1 }
 0x6bf   : > { %v1361_v4 = vmul.f32 %v1358_v2, %v1358_v2 }
 0x6c1   : > { %v1368_v5 = vsel %vm914_vm3, %v1361_v4, 0.0 }
 0x6c2   : > { %1369 = vadd.xlane.f32.xlu1 %v1368_v5 }
 0x710   : > { %v1364_v7 = vpop.xlane.xlu1 %1363 }
 0x711   : > { %v1371_v8 = vmul.f32 %v1364_v7, %v2584_v33 }
 0x713   : > { %v1374_v10 = vadd.f32 1e-06, %v1371_v8 }
 0x715   : > { %2181 = vrsqrt.f32 %v1374_v10  ;;  %vm1383_vm2 = vweird.f32 %v1374_v10 }
 0x718   : > { %v1367_v11 = vpop.xlane.xlu2 %1366 }
 0x719   : > { %v1372_v12 = vmul.f32 %v1367_v11, %v2584_v33 }
 0x71b   : > { %v2182_v13 = vpop.eup %2181  ;;  %v1375_v14 = vadd.f32 1e-06, %v1372_v12 }
 0x71c   : > { %v1378_v15 = vmul.f32 %v2182_v13, %v1374_v10  ;;  %vm1384_vm1 = vweird.f32 %v2182_v13 }
 0x71d   : > { %2183 = vrsqrt.f32 %v1375_v14  ;;  %vm1385_vm4 = vmor %vm1383_vm2, %vm1384_vm1  ;;  %vm1393_vm6 = vweird.f32 %v1375_v14 }
 0x71e   : > { %v1379_v16 = vmul.f32 %v2182_v13, %v1378_v15 }
 0x720   : > { %v1380_v17 = vmul.f32 0.5, %v1379_v16 }
 0x722   : > { %v1381_v18 = vsub.f32 1.5, %v1380_v17 }
 0x723   : > { %v2184_v19 = vpop.eup %2183 }
 0x724   : > { %v1382_v20 = vmul.f32 %v2182_v13, %v1381_v18  ;;  %v1388_v23 = vmul.f32 %v2184_v19, %v1375_v14  ;;  %vm1394_vm5 = vweird.f32 %v2184_v19 }
 0x725   : > { %vm1395_vm7 = vmor %vm1393_vm6, %vm1394_vm5 }
 0x726   : > { %v1389_v24 = vmul.f32 %v2184_v19, %v1388_v23  ;;  %v1386_v3 = vsel %vm1385_vm4, %v2182_v13, %v1382_v20 }
 0x727   : > { %v1407_v28 = vmul.f32 %v1386_v3, %v1356_v25  ;;  %v2048_v25 = vld [vmem:[%s2542_s29 + $0x28] sm:$0xff] }
 0x728   : > { %v1390_v26 = vmul.f32 0.5, %v1389_v24  ;;  %1567 = vmatpush.bf16.msrb.mxu3 %v2048_v25 }
 0x729   : > { %v1413_v34 = vmul.f32 %v2144_v29, %v1407_v28 }
 0x72a   : > { %v1391_v27 = vsub.f32 1.5, %v1390_v26 }
 0x72b   : > { %v1419_v37 = vadd.f32 %v2145_v35, %v1413_v34 }
 0x72c   : > { %v1392_v30 = vmul.f32 %v2184_v19, %v1391_v27  ;;  %1568 = vmatpush.bf16.msrb.mxu3 %v2047_v59 }
 0x72e   : > { %v1396_v31 = vsel %vm1395_vm7, %v2184_v19, %v1392_v30 }
 0x72f   : > { %v1408_v32 = vmul.f32 %v1396_v31, %v1357_v62  ;;  %v2146_v62 = vld [vmem:[%s2903_s5] ss:$0 sm:$0xff] }
 0x730   : > { %1569 = vmatpush.bf16.msrb.mxu3 %v2046_v60 }
 0x731   : > { %v1414_v36 = vmul.f32 %v2144_v29, %v1408_v32 }
 0x733   : > { %v1420_v38 = vadd.f32 %v2145_v35, %v1414_v36 }
 0x734   : > { %1570 = vmatpush.bf16.msrb.mxu3 %v2045_v61 }
 0x735   : > { %v1370_v39 = vpop.xlane.xlu1 %1369  ;;  %v1422_v41 = vpack.c.bf16 %v1420_v38, %v1419_v37 }
 0x736   : > { %v1373_v42 = vmul.f32 %v1370_v39, %v2584_v33  ;;  %v2147_v39 = vld [vmem:[%s829_s4] ss:$0 sm:$0xff] }
 0x737   : > { %1990 = vmatmul.msk.bf16.vlgmr.msrb.gmra.mxu1 %vm914_vm3, %v1422_v41  ;;  %v2148_v41 = vld [vmem:[%s832_s3] ss:$0 sm:$0xff] }
 0x738   : > { %v1376_v43 = vadd.f32 1e-06, %v1373_v42  ;;  %1571 = vmatpush.bf16.msrb.mxu3 %v2044_v22 }
 0x73a   : > { %2185 = vrsqrt.f32 %v1376_v43  ;;  %vm1403_vm9 = vweird.f32 %v1376_v43 }
 0x73c   : > { %1572 = vmatpush.bf16.msrb.mxu3 %v2043_v40 }
 0x740   : > { %v2186_v44 = vpop.eup %2185 }
 0x741   : > { %v1398_v46 = vmul.f32 %v2186_v44, %v1376_v43  ;;  %vm1404_vm8 = vweird.f32 %v2186_v44 }
 0x742   : > { %vm1405_vm10 = vmor %vm1403_vm9, %vm1404_vm8 }
 0x743   : > { %v1399_v47 = vmul.f32 %v2186_v44, %v1398_v46 }
 0x745   : > { %v1400_v48 = vmul.f32 0.5, %v1399_v47 }
 0x747   : > { %v1401_v49 = vsub.f32 1.5, %v1400_v48 }
 0x749   : > { %v1402_v51 = vmul.f32 %v2186_v44, %v1401_v49 }
 0x74b   : > { %v1406_v52 = vsel %vm1405_vm10, %v2186_v44, %v1402_v51 }
 0x74c   : > { %v1409_v53 = vmul.f32 %v1406_v52, %v1358_v2 }
 0x74e   : > { %v1415_v54 = vmul.f32 %v2144_v29, %v1409_v53 }
 0x750   : > { %v1421_v55 = vadd.f32 %v2145_v35, %v1415_v54 }
 0x752   : > { %v1423_v56 = vpack.c.bf16 %v1421_v55, %v1421_v55 }
 0x754   : > { %1991 = vmatmul.msk.bf16.gmra.mxu1 %vm914_vm3, %v1423_v56 }
 0x7b4   : > { %v1459_v63 = vpop.f32.mrf.mxu1 }
 0x7b5   : > { %v1460_v0 = vadd.f32 %v2146_v62, %v1459_v63 }
 0x7b7   : > { %v1468_v1 = vmul.f32 %v1460_v0, %v1460_v0 }
 0x7b9   : > { %v1471_v2 = vmul.f32 %v1468_v1, %v1460_v0 }
 0x7bb   : > { %v1474_v4 = vmul.f32 0.044715, %v1471_v2 }
 0x7bc   : > { %v1461_v5 = vpop.f32.mrf.mxu1 }
 0x7bd   : > { %v1477_v6 = vadd.f32 %v1474_v4, %v1460_v0  ;;  %v1462_v7 = vadd.f32 %v2146_v62, %v1461_v5 }
 0x7bf   : > { %v1480_v8 = vmul.f32 0.7978846, %v1477_v6  ;;  %v1469_v9 = vmul.f32 %v1462_v7, %v1462_v7 }
 0x7c1   : > { %v1472_v10 = vmul.f32 %v1469_v9, %v1462_v7  ;;  %2187 = vtanh.f32 %v1480_v8 }
 0x7c3   : > { %v1475_v11 = vmul.f32 0.044715, %v1472_v10 }
 0x7c5   : > { %v1478_v12 = vadd.f32 %v1475_v11, %v1462_v7 }
 0x7c7   : > { %v1481_v13 = vmul.f32 0.7978846, %v1478_v12  ;;  %v2188_v14 = vpop.eup %2187 }
 0x7c8   : > { %v1486_v15 = vadd.f32 1.0, %v2188_v14 }
 0x7c9   : > { %2189 = vtanh.f32 %v1481_v13 }
 0x7ca   : > { %v1489_v18 = vmul.f32 0.5, %v1486_v15 }
 0x7cc   : > { %v1492_v3 = vmul.f32 %v1489_v18, %v1460_v0 }
 0x7cf   : > { %v2190_v16 = vpop.eup %2189 }
 0x7d0   : > { %v1487_v17 = vadd.f32 1.0, %v2190_v16 }
 0x7d1   : > { %v1464_v19 = vpop.f32.mrf.mxu1 }
 0x7d2   : > { %v1465_v20 = vadd.f32 %v2146_v62, %v1464_v19  ;;  %v1490_v23 = vmul.f32 0.5, %v1487_v17 }
 0x7d4   : > { %v1470_v24 = vmul.f32 %v1465_v20, %v1465_v20  ;;  %v1493_v26 = vmul.f32 %v1490_v23, %v1462_v7 }
 0x7d6   : > { %v1473_v27 = vmul.f32 %v1470_v24, %v1465_v20  ;;  %v1495_v28 = vpack.c.bf16 %v1493_v26, %v1492_v3 }
 0x7d8   : > { %v1476_v29 = vmul.f32 0.044715, %v1473_v27  ;;  %1573 = vmatmul.bf16.vlgmr.msrb.gmra.mxu3 %v1495_v28 }
 0x7d9   : > { %v1466_v30 = vpop.f32.mrf.mxu1 }
 0x7da   : > { %v1479_v31 = vadd.f32 %v1476_v29, %v1465_v20 }
 0x7dc   : > { %v1482_v32 = vmul.f32 0.7978846, %v1479_v31 }
 0x7de   : > { %2191 = vtanh.f32 %v1482_v32 }
 0x7e4   : > { %v2192_v34 = vpop.eup %2191 }
 0x7e5   : > { %v1488_v35 = vadd.f32 1.0, %v2192_v34 }
 0x7e7   : > { %v1491_v36 = vmul.f32 0.5, %v1488_v35 }
 0x7e9   : > { %v1494_v37 = vmul.f32 %v1491_v36, %v1465_v20 }
 0x7eb   : > { %v1496_v38 = vpack.c.bf16 %v1494_v37, %v1494_v37 }
 0x7ed   : > { %1578 = vmatmul.bf16.gmra.mxu3 %v1496_v38 }
 0x85b   : > { %v1574_v42 = vpop.f32.mrf.mxu3 }
 0x85c   : > { %v1575_v43 = vadd.f32 %v2147_v39, %v1574_v42 }
 0x85e   : > { %v1587_v44 = vmul.f32 %v2148_v41, %v1575_v43 }
 0x860   : > { %v1590_v46 = vadd.f32 %v1587_v44, %v2684_v45 }
 0x862   : > { %1593 = vst.msk [vmem:[#allocation2] sm:$0xff] %vm914_vm3, %v1590_v46 }
 0x863   : > { %v1576_v47 = vpop.f32.mrf.mxu3 }
 0x864   : > { %v1577_v48 = vadd.f32 %v2147_v39, %v1576_v47 }
 0x866   : > { %v1588_v49 = vmul.f32 %v2148_v41, %v1577_v48 }
 0x868   : > { %v1591_v51 = vadd.f32 %v1588_v49, %v2689_v50 }
 0x86a   : > { %1594 = vst.msk [vmem:[#allocation2 + $0x8] sm:$0xff] %vm914_vm3, %v1591_v51 }
 0x870   : > { %v1579_v52 = vpop.f32.mrf.mxu3 }
 0x871   : > { %v1580_v53 = vadd.f32 %v2147_v39, %v1579_v52 }
 0x873   : > { %v1589_v54 = vmul.f32 %v2148_v41, %v1580_v53 }
 0x874   : > { %1599 = sbr.rel (%p2024_p1) target bundleno = 2461 (0x99d), region = 104 }
 0x875   : > { %v1592_v55 = vadd.f32 %v1589_v54, %v2694_v21 }
 0x877   : > { %1595 = vst.msk [vmem:[#allocation2 + $0x10] sm:$0xff] %vm914_vm3, %v1592_v55 }
 0x878   : > { %v1581_v56 = vpop.f32.mrf.mxu3 }
 0x879   : > { %v1602_v45 = vsel %vm914_vm3, %v1590_v46, 0.0  ;;  %v1608_v57 = vsel %vm914_vm3, %v1592_v55, 0.0  ;;  %v1605_v50 = vsel %vm914_vm3, %v1591_v51, 0.0  ;;  %v2193_v29 = vld [vmem:[%s2906_s20] ss:$0 sm:$0xff]  ;;  %vm1694_vm5 = vcmask 258049  }
 0x87a   : > { %1603 = vadd.xlane.f32.xlu0 %v1602_v45  ;;  %1609 = vadd.xlane.f32.xlu1 %v1608_v57  ;;  %v2194_v35 = vld [vmem:[%s2907_s7] ss:$0 sm:$0xff] }
 0x882   : > { %1606 = vadd.xlane.f32.xlu0 %v1605_v50 }
 0x8ed   : > { %v1604_v58 = vpop.xlane.xlu0 %1603  ;;  %v1610_v60 = vpop.xlane.xlu1 %1609 }
 0x8ee   : > { %v1611_v25 = vmul.f32 %v1604_v58, %v2584_v33  ;;  %v1613_v63 = vmul.f32 %v1610_v60, %v2584_v33 }
 0x8f0   : > { %v1614_v59 = vsub.f32 %v1590_v46, %v1611_v25  ;;  %v1616_v0 = vsub.f32 %v1592_v55, %v1613_v63 }
 0x8f2   : > { %v1617_v21 = vmul.f32 %v1614_v59, %v1614_v59  ;;  %v1619_v4 = vmul.f32 %v1616_v0, %v1616_v0 }
 0x8f4   : > { %v1620_v61 = vsel %vm914_vm3, %v1617_v21, 0.0  ;;  %v1626_v5 = vsel %vm914_vm3, %v1619_v4, 0.0 }
 0x8f5   : > { %1621 = vadd.xlane.f32.xlu1 %v1620_v61  ;;  %v1607_v22 = vpop.xlane.xlu0 %1606 }
 0x8f6   : > { %v1612_v62 = vmul.f32 %v1607_v22, %v2584_v33 }
 0x8f8   : > { %v1615_v40 = vsub.f32 %v1591_v51, %v1612_v62 }
 0x8fa   : > { %v1618_v1 = vmul.f32 %v1615_v40, %v1615_v40 }
 0x8fc   : > { %v1623_v2 = vsel %vm914_vm3, %v1618_v1, 0.0 }
 0x8fd   : > { %1624 = vadd.xlane.f32.xlu2 %v1623_v2 }
 0x905   : > { %1627 = vadd.xlane.f32.xlu2 %v1626_v5 }
 0x968   : > { %v1622_v6 = vpop.xlane.xlu1 %1621 }
 0x969   : > { %v1629_v7 = vmul.f32 %v1622_v6, %v2584_v33 }
 0x96b   : > { %v1632_v8 = vadd.f32 1e-06, %v1629_v7 }
 0x96d   : > { %2195 = vrsqrt.f32 %v1632_v8  ;;  %vm1641_vm11 = vweird.f32 %v1632_v8 }
 0x970   : > { %v1625_v9 = vpop.xlane.xlu2 %1624 }
 0x971   : > { %v1630_v10 = vmul.f32 %v1625_v9, %v2584_v33 }
 0x973   : > { %v2196_v11 = vpop.eup %2195  ;;  %v1633_v12 = vadd.f32 1e-06, %v1630_v10 }
 0x974   : > { %v1636_v13 = vmul.f32 %v2196_v11, %v1632_v8  ;;  %vm1642_vm3 = vweird.f32 %v2196_v11 }
 0x975   : > { %2197 = vrsqrt.f32 %v1633_v12  ;;  %vm1643_vm12 = vmor %vm1641_vm11, %vm1642_vm3  ;;  %vm1651_vm14 = vweird.f32 %v1633_v12 }
 0x976   : > { %v1637_v14 = vmul.f32 %v2196_v11, %v1636_v13 }
 0x978   : > { %v1638_v15 = vmul.f32 0.5, %v1637_v14  ;;  %v1628_v16 = vpop.xlane.xlu2 %1627 }
 0x979   : > { %v1631_v17 = vmul.f32 %v1628_v16, %v2584_v33 }
 0x97a   : > { %v1639_v18 = vsub.f32 1.5, %v1638_v15 }
 0x97b   : > { %v2198_v19 = vpop.eup %2197  ;;  %v1634_v20 = vadd.f32 1e-06, %v1631_v17 }
 0x97c   : > { %v1640_v23 = vmul.f32 %v2196_v11, %v1639_v18  ;;  %v1646_v24 = vmul.f32 %v2198_v19, %v1633_v12  ;;  %vm1652_vm13 = vweird.f32 %v2198_v19 }
 0x97d   : > { %2199 = vrsqrt.f32 %v1634_v20  ;;  %vm1653_vm15 = vmor %vm1651_vm14, %vm1652_vm13  ;;  %vm1661_vm2 = vweird.f32 %v1634_v20 }
 0x97e   : > { %v1644_v3 = vsel %vm1643_vm12, %v2196_v11, %v1640_v23  ;;  %v1647_v26 = vmul.f32 %v2198_v19, %v1646_v24 }
 0x97f   : > { %v1665_v28 = vmul.f32 %v1644_v3, %v1614_v59 }
 0x980   : > { %v1648_v27 = vmul.f32 0.5, %v1647_v26 }
 0x981   : > { %v1671_v34 = vmul.f32 %v2193_v29, %v1665_v28 }
 0x982   : > { %v1649_v30 = vsub.f32 1.5, %v1648_v27 }
 0x983   : > { %v2200_v33 = vpop.eup %2199  ;;  %v1677_v41 = vadd.f32 %v2194_v35, %v1671_v34 }
 0x984   : > { %v1650_v31 = vmul.f32 %v2198_v19, %v1649_v30  ;;  %v1656_v32 = vmul.f32 %v2200_v33, %v1634_v20  ;;  %vm1662_vm1 = vweird.f32 %v2200_v33 }
 0x985   : > { %v1682_v47 = vrot.slane %v1677_v41, 4  ;;  %vm1663_vm4 = vmor %vm1661_vm2, %vm1662_vm1 }
 0x986   : > { %v1654_v36 = vsel %vm1653_vm15, %v2198_v19, %v1650_v31  ;;  %v1657_v37 = vmul.f32 %v2200_v33, %v1656_v32 }
 0x987   : > { %v1666_v38 = vmul.f32 %v1654_v36, %v1615_v40 }
 0x988   : > { %v1658_v39 = vmul.f32 0.5, %v1657_v37 }
 0x989   : > { %v1672_v42 = vmul.f32 %v2193_v29, %v1666_v38 }
 0x98a   : > { %v1659_v43 = vsub.f32 1.5, %v1658_v39 }
 0x98b   : > { %v1678_v44 = vadd.f32 %v2194_v35, %v1672_v42 }
 0x98c   : > { %v1660_v46 = vmul.f32 %v2200_v33, %v1659_v43 }
 0x98d   : > { %v1683_v48 = vrot.slane %v1678_v44, 4 }
 0x98e   : > { %v1664_v49 = vsel %vm1663_vm4, %v2200_v33, %v1660_v46 }
 0x98f   : > { %v1684_v51 = vsel %vm1138_vm0, %v1682_v47, %v1683_v48  ;;  %v1667_v52 = vmul.f32 %v1664_v49, %v1616_v0 }
 0x990   : > { %v1686_v54 = vadd.f32 %v1684_v51, %v1677_v41 }
 0x991   : > { %v1673_v53 = vmul.f32 %v2193_v29, %v1667_v52 }
 0x992   : > { %v1687_v45 = vadd.f32 %v1686_v54, %v1678_v44 }
 0x993   : > { %v1679_v55 = vadd.f32 %v2194_v35, %v1673_v53 }
 0x995   : > { %v1689_v56 = vrot.slane %v1679_v55, 4 }
 0x997   : > { %v1690_v57 = vsel %vm1138_vm0, %v1683_v48, %v1689_v56 }
 0x998   : > { %v1692_v50 = vadd.f32 %v1690_v57, %v1687_v45 }
 0x99a   : > { %v1693_v58 = vmul.f32 0.25, %v1692_v50 }
 0x99c   : > { %1695 = vst.msk [vmem:[%s777_s26 - $0x1] sm:$0x1e] %vm1694_vm5, %v1693_v58 }
 0x99d PF: > { %s2908_s21 = sld [smem:[#allocation10_spill]]  ;;  %s1709_s0 = sshll.u32 %s777_s26, 4  ;;  %s1710_s0 = int_to_ptr.vmem [resolvable:$true] %s1709_s0 }
 0x99e   : > { %s2909_s23 = sld [smem:[#allocation7_spill]] }
 0x99f   : > { %s2911_s29 = sld [smem:[#allocation29_spill]] }
 0x9a3   : > { %s2026_s30 = sshll.u32 %s2908_s21, 2 }
 0x9a4   : > { %s2912_s16 = sand.u32 1, %s2909_s23  }
 0x9a5   : > { %s1707_s27 = scalar_lea.hbm %s2911_s29, %s2026_s30  ;;  %s1697_s2 = scalar_lea.sflag [#allocation4], %s2912_s16 }
 0x9a6   : > { %s1711_s17 = sshll.u32 %s1707_s27, 4  ;;  %s2221_s1 = scalar_lea.hbm %s2911_s29, 8  ;;  %s1712_s17 = int_to_ptr.hbm [resolvable:$true] %s1711_s17 }
 0x9a7   : > { %s2215_s4 = sshra.s32 %s1712_s17, 4  ;;  %s2216_s4 = int_to_ptr.hbm [resolvable:$true] %s2215_s4 }
 0x9a8   : > { %s2217_s3 = scalar_lea.hbm %s2216_s4, 4  ;;  %p2222_p6 = scmp.lt.s32.totalorder %s2216_s4, %s2911_s29 }
 0x9a9   : > { %p2218_p2 = scmp.ne.s32.totalorder %s2216_s4, %s2217_s3  ;;  %p2223_p7 = scmp.lt.s32.totalorder %s2221_s1, %s2217_s3 }
 0x9ab   : > { %p2219_p4 = pnand %p2218_p2, %p2454_p3  ;;  %p2224_p8 = por %p2223_p7, %p2222_p6 }
 0x9ad   : > { %p2220_p5 = pneg %p2219_p4 }
 0x9af   : > { %p2225_p10 = pnand %p2224_p8, %p2220_p5 }
 0x9b1   : > { %2228 = shalt.err (!%p2225_p10)
}
 0x9b2   : > { %2055 = dma.vmem_to_hbm [thread:$0]  (%p2454_p3), %s1710_s0, 64, %s1712_s17, %s1697_s2  }
 0x9b3 PF: > { %s2913_s22 = sld [smem:[#allocation13_spill]] }
 0x9b4   : > { %s2914_s26 = sld [smem:[#allocation6_spill]] }
 0x9b9   : > { %p2061_p11 = scmp.ge.s32.totalorder %s2913_s22, 2 }
 0x9ba   : > { %s1723_s30 = sand.u32 1, %s2914_s26  }
 0x9bb   : > { %p2058_p12 = pnand %p2061_p11, %p2464_p9  ;;  %s1724_s25 = scalar_lea.sflag [#allocation4], %s1723_s30 }
 0x9bd   : > { %p2059_p13 = pneg %p2058_p12 }
 0x9bf   : > { %2262 = dma.done.wait (%p2059_p13), %s1724_s25, 64  }
 0x9c0   : > { %2264 = vsyncadd (%p2059_p13), %s1724_s25, 4294967232  ;;  %s32_s23 = sadd.s32 1, %s2913_s22   ;;  %s2916_s0 = sld [smem:[#allocation7_spill]] }
 0x9c1   : > { %p29_p0 = scmp.ge.s32.totalorder %s32_s23, 6   ;;  %s2917_s30 = sld [smem:[#allocation8_spill]] }
 0x9c2   : > { %s2918_s20 = sld [smem:[#allocation18_spill]] }
 0x9c3   : > { %s2919_s21 = sld [smem:[#allocation11_spill]]  ;;  %31 = sbr.rel (!%p29_p0) target bundleno = 17 (0x11), region = 181 }
 0x9c4   : > { %s2920_s1 = sld [smem:[#allocation12_spill]] }
 0x9c5   : > { %s2921_s22 = sld [smem:[#allocation14_spill]] }
 0x9c6   : > { %s2922_s2 = sld [smem:[#allocation16_spill]] }
 0x9c8   :  { %1730 = vsyncpa [#allocation4], 1 }
 0x9c9   :  { %1732 = vsyncpa [#allocation4 + $0x1], 1 }

</bundles_post_ra>
